<compile_context>
chip_gen: v6e
topology: v6e:2x2x1
jax: 0.10.0
libtpu: 0.0.40
codegen_flags: <defaults>
</compile_context>

<pallas_src>
import functools
import math

import jax
import jax.numpy as jnp
from jax import lax
from jax.experimental import pallas as pl
from jax.experimental.pallas import tpu as pltpu

SQRT_HALF = math.sqrt(0.5)


# ----------------------------------------------------------------------------
# Fused WaveNet kernel: grid = (B,), all units fused in one invocation
# ----------------------------------------------------------------------------
def _wavenet_kernel(x_ref, mask_ref, w_in_ref, b_in_ref, w_sr_ref, b_sr_ref,
                    out_ref, *, P, M, W, C, G, S, L, dilations):
    """One batch element: the full stack of L gated activation units.

    Layout: activations are (channels, flat padded plane).  The padded plane
    has width W = T + 2*Dw and height H = F + 2*Dh; valid pixel (f, t) sits at
    flat plane index (Dh + f) * W + (Dw + t), everything else is zero.  Buffers
    carry an extra margin of M zeros on both ends of the lane axis so every
    im2col tap is a contiguous in-bounds slice of length P.
    """
    x = x_ref[0]                      # (C, P + 2M) f32; margins + border zero
    mask = mask_ref[...]              # (1, P) f32; 1.0 on valid pixels
    mask_res = mask * SQRT_HALF       # hoisted: fuses residual scale + re-mask
    zc = jnp.zeros((C, M), jnp.float32)
    zg = jnp.zeros((G, M), jnp.float32)
    skip = jnp.zeros((S, P), jnp.float32)

    def im2col(plane, dh, dw):
        # 3x3 'same'-conv taps as 9 contiguous slices of the flat plane; row
        # order (kh, kw, ci) matches w.reshape(9*Cin, Cout).T packing.
        cols = []
        for kh in range(3):
            for kw in range(3):
                off = M + (kh - 1) * dh * W + (kw - 1) * dw
                cols.append(plane[:, off:off + P])
        # one f32 concat + one bf16 cast per conv (not 9 per-slice casts)
        return jnp.concatenate(cols, axis=0).astype(jnp.bfloat16)

    # Static unroll: dilations, slice offsets and weight indices are static,
    # so there is no cond ladder and no dynamic lane slicing.
    for l in range(L):
        dh, dw = dilations[l]
        # in_layer (dilated 3x3 conv, BN folded) + gated activation
        a = jnp.dot(w_in_ref[l], im2col(x, dh, dw),
                    preferred_element_type=jnp.float32) + b_in_ref[l]   # (2G,P)
        g = jnp.tanh(a[:G]) * jax.nn.sigmoid(a[G:]) * mask              # (G, P)
        gp = jnp.concatenate([zg, g, zg], axis=1)                        # (G,P+2M)
        # fused skip + res 3x3 convs (dilation (1,1)) as one matmul
        sr = jnp.dot(w_sr_ref[l], im2col(gp, 1, 1),
                     preferred_element_type=jnp.float32) + b_sr_ref[l]  # (S+R,P)
        skip = skip + sr[:S]
        xin = (x[:, M:M + P] + sr[S:]) * mask_res                        # (C, P)
        x = jnp.concatenate([zc, xin, zc], axis=1)

    out_ref[0] = skip * (1.0 / math.sqrt(L))


# ----------------------------------------------------------------------------
# Wrapper: pack weights, build the padded flat plane, call the kernel
# ----------------------------------------------------------------------------
def wavenet2dft_forward(x_bcft, units):
    x = x_bcft.astype(jnp.float32)            # NCHW = (B, C, F, T)
    B, C, F, T = x.shape
    L = len(units)
    G = units[0]["w_in"].shape[-1] // 2
    S = units[0]["w_skip"].shape[-1]
    R = units[0]["w_res"].shape[-1]
    assert R == C

    dil = [(int(p["dilation"][0]), int(p["dilation"][1])) for p in units]
    Dh = max(d[0] for d in dil)
    Dw = max(d[1] for d in dil)
    W = T + 2 * Dw
    H = F + 2 * Dh
    P = H * W                                  # flat padded plane (lane axis)
    M = ((Dh * W + Dw + 127) // 128) * 128     # lane-aligned tap margin
    Ppad = P + 2 * M

    # Flat, zero-bordered, margin-padded input plane: (B, C, Ppad).
    xpad = jnp.pad(x, ((0, 0), (0, 0), (Dh, Dh), (Dw, Dw))).reshape(B, C, P)
    xpad = jnp.pad(xpad, ((0, 0), (0, 0), (M, M)))

    # Valid-pixel mask over the plane (keeps the 'same' zero border exact).
    mask = jnp.zeros((H, W), jnp.float32).at[Dh:Dh + F, Dw:Dw + T].set(1.0)
    mask = mask.reshape(1, P)

    # Per-unit weights packed as (Cout, 9*Cin) in (kh, kw, ci) order; bf16 for
    # the MXU, biases kept f32 as (Cout, 1) lane-broadcast columns.
    w_in = jnp.stack([p["w_in"].reshape(9 * C, 2 * G).T for p in units]
                     ).astype(jnp.bfloat16)                       # (L, 2G, 9C)
    b_in = jnp.stack([p["b_in"].reshape(2 * G, 1) for p in units])  # (L,2G,1)
    w_sr = jnp.stack([
        jnp.concatenate([p["w_skip"].reshape(9 * G, S),
                         p["w_res"].reshape(9 * G, R)], axis=-1).T
        for p in units]).astype(jnp.bfloat16)                     # (L,S+R,9G)
    b_sr = jnp.stack([
        jnp.concatenate([p["b_skip"], p["b_res"]]).reshape(S + R, 1)
        for p in units])                                          # (L,S+R,1)

    kernel = functools.partial(
        _wavenet_kernel, P=P, M=M, W=W, C=C, G=G, S=S, L=L,
        dilations=tuple(dil))

    flops = int(2 * B * L * P * (2 * G * 9 * C + (S + R) * 9 * G))
    bytes_accessed = int(xpad.size * 4 + mask.size * 4 + w_in.size * 2
                         + w_sr.size * 2 + (b_in.size + b_sr.size) * 4
                         + B * S * P * 4)
    cost = pl.CostEstimate(flops=flops,
                           transcendentals=int(2 * B * L * G * P),
                           bytes_accessed=bytes_accessed)

    out_flat = pl.pallas_call(
        kernel,
        out_shape=jax.ShapeDtypeStruct((B, S, P), jnp.float32),
        grid=(B,),
        in_specs=[
            pl.BlockSpec((1, C, Ppad), lambda b: (b, 0, 0)),
            pl.BlockSpec((1, P), lambda b: (0, 0)),
            pl.BlockSpec((L, 2 * G, 9 * C), lambda b: (0, 0, 0)),
            pl.BlockSpec((L, 2 * G, 1), lambda b: (0, 0, 0)),
            pl.BlockSpec((L, S + R, 9 * G), lambda b: (0, 0, 0)),
            pl.BlockSpec((L, S + R, 1), lambda b: (0, 0, 0)),
        ],
        out_specs=pl.BlockSpec((1, S, P), lambda b: (b, 0, 0)),
        compiler_params=pltpu.CompilerParams(
            dimension_semantics=("parallel",)),
        cost_estimate=cost,
    )(xpad, mask, w_in, b_in, w_sr, b_sr)

    # Layout plumbing only (no compute): extract the valid (F, T) window.
    out = out_flat.reshape(B, S, H, W)[:, :, Dh:Dh + F, Dw:Dw + T]
    return out                                 # NCHW = (B, skip_dim, F, T)


# ----------------------------------------------------------------------------
# Parameter initialization (deterministic, BN folded into conv)
# ----------------------------------------------------------------------------
def _fold_bn(w, b, gamma, beta, mean, var, eps=1e-5):
    s = gamma / jnp.sqrt(var + eps)
    return w * s, (b - mean) * s + beta


def _init_unit_params(key, residual_dim, gate_dim, skip_dim, dilation):
    ks = jax.random.split(key, 9)

    def conv_w(k, cin, cout):
        fan_in = cin * 3 * 3
        return jax.random.normal(k, (3, 3, cin, cout), jnp.float32) / math.sqrt(fan_in)

    def conv_b(k, cout):
        return 0.1 * jax.random.normal(k, (cout,), jnp.float32)

    def bn(k, c):
        k1, k2, k3, k4 = jax.random.split(k, 4)
        gamma = 1.0 + 0.1 * jax.random.normal(k1, (c,), jnp.float32)
        beta = 0.1 * jax.random.normal(k2, (c,), jnp.float32)
        mean = 0.1 * jax.random.normal(k3, (c,), jnp.float32)
        var = 0.5 + jax.random.uniform(k4, (c,), jnp.float32)
        return gamma, beta, mean, var

    w_in, b_in = _fold_bn(conv_w(ks[0], residual_dim, 2 * gate_dim),
                          conv_b(ks[1], 2 * gate_dim), *bn(ks[2], 2 * gate_dim))
    w_sk, b_sk = _fold_bn(conv_w(ks[3], gate_dim, skip_dim),
                          conv_b(ks[4], skip_dim), *bn(ks[5], skip_dim))
    w_re, b_re = _fold_bn(conv_w(ks[6], gate_dim, residual_dim),
                          conv_b(ks[7], residual_dim), *bn(ks[8], residual_dim))
    return dict(w_in=w_in, b_in=b_in, w_skip=w_sk, b_skip=b_sk,
                w_res=w_re, b_res=b_re, dilation=dilation)


def init_wavenet_params(key, residual_dim, gate_dim, skip_dim,
                        dilation_list, n_stages):
    units = []
    keys = jax.random.split(key, n_stages * len(dilation_list))
    i = 0
    for _ in range(n_stages):
        for d in dilation_list:
            units.append(_init_unit_params(keys[i], residual_dim, gate_dim,
                                           skip_dim, d))
            i += 1
    return units


# ----------------------------------------------------------------------------
# Pure-JAX references (f32 and bf16-matmul-matched)
# ----------------------------------------------------------------------------
def _ref_conv(x, w, b, dilation, cast_bf16):
    dh, dw = dilation
    if cast_bf16:
        x = x.astype(jnp.bfloat16)
        w = w.astype(jnp.bfloat16)
    y = lax.conv_general_dilated(
        x, w, window_strides=(1, 1), padding=((dh, dh), (dw, dw)),
        rhs_dilation=(dh, dw),
        dimension_numbers=("NHWC", "HWIO", "NHWC"),
        preferred_element_type=jnp.float32)
    return y + b


def ref_forward(x_bcft, units, cast_bf16):
    x = jnp.transpose(x_bcft, (0, 2, 3, 1)).astype(jnp.float32)
    skip_sum = 0.0
    for p in units:
        gate_dim = p["w_in"].shape[-1] // 2
        a = _ref_conv(x, p["w_in"], p["b_in"], p["dilation"], cast_bf16)
        g = jnp.tanh(a[..., :gate_dim]) * jax.nn.sigmoid(a[..., gate_dim:])
        skip = _ref_conv(g, p["w_skip"], p["b_skip"], (1, 1), cast_bf16)
        res = _ref_conv(g, p["w_res"], p["b_res"], (1, 1), cast_bf16)
        x = (x + res) * SQRT_HALF
        skip_sum = skip_sum + skip
    skip_sum = skip_sum * math.sqrt(1.0 / len(units))
    return jnp.transpose(skip_sum, (0, 3, 1, 2))


# ----------------------------------------------------------------------------
# Main
# ----------------------------------------------------------------------------
if __name__ == "__main__":
    key = jax.random.PRNGKey(0)
    kparams, kx = jax.random.split(key)

    B, F, T = 2, 16, 16
    residual_dim, gate_dim, skip_dim = 8, 8, 8
    dilation_list = [(1, 1), (2, 2)]
    n_stages = 1

    units = init_wavenet_params(kparams, residual_dim, gate_dim, skip_dim,
                                dilation_list, n_stages)
    x_bcft = jax.random.normal(kx, (B, residual_dim, F, T), jnp.float32)

    out = jax.jit(lambda x: wavenet2dft_forward(x, units))(x_bcft)
    out = jax.block_until_ready(out)

    assert out.shape == (B, skip_dim, F, T), out.shape

    # Strict check against a reference using the same bf16-input / f32-accum
    # conv numerics as the kernel.
    ref_bf16 = ref_forward(x_bcft, units, cast_bf16=True)
    err_bf16 = float(jnp.max(jnp.abs(out - ref_bf16)))
    if err_bf16 > 5e-3:
        raise AssertionError(f"Pallas vs bf16-matched reference: {err_bf16}")

    # Loose sanity check against the full-f32 reference (bf16 quantization).
    ref_f32 = ref_forward(x_bcft, units, cast_bf16=False)
    err_f32 = float(jnp.max(jnp.abs(out - ref_f32)))
    if err_f32 > 1e-1:
        raise AssertionError(f"Pallas vs f32 reference: {err_f32}")

    print("KERNEL_OK")
</pallas_src>

<mosaic_0001>
module attributes {stable_mosaic.version = 11 : i64} {
  func.func @_wavenet_kernel(%arg0: i32, %arg1: memref<1x8x656xf32, #tpu.memory_space<vmem>>, %arg2: memref<1x400xf32, #tpu.memory_space<vmem>>, %arg3: memref<2x16x72xbf16, #tpu.memory_space<vmem>>, %arg4: memref<2x16x1xf32, #tpu.memory_space<vmem>>, %arg5: memref<2x16x72xbf16, #tpu.memory_space<vmem>>, %arg6: memref<2x16x1xf32, #tpu.memory_space<vmem>>, %arg7: memref<1x8x400xf32, #tpu.memory_space<vmem>>) attributes {dimension_semantics = [#tpu.dimension_semantics<parallel>], iteration_bounds = array<i64: 2>, scalar_prefetch = 0 : i64, scratch_operands = 0 : i64, tpu.core_type = #tpu.core_type<tc>, window_params = [{transform_indices = @transform_0, window_bounds = array<i64: 1, 8, 656>}, {pipeline_mode = #tpu.pipeline_mode<synchronous>, transform_indices = @transform_1, window_bounds = array<i64: 1, 400>}, {pipeline_mode = #tpu.pipeline_mode<synchronous>, transform_indices = @transform_2, window_bounds = array<i64: 2, 16, 72>}, {pipeline_mode = #tpu.pipeline_mode<synchronous>, transform_indices = @transform_3, window_bounds = array<i64: 2, 16, 1>}, {pipeline_mode = #tpu.pipeline_mode<synchronous>, transform_indices = @transform_4, window_bounds = array<i64: 2, 16, 72>}, {pipeline_mode = #tpu.pipeline_mode<synchronous>, transform_indices = @transform_5, window_bounds = array<i64: 2, 16, 1>}, {transform_indices = @transform_6, window_bounds = array<i64: 1, 8, 400>}]} {
    %c0 = arith.constant 0 : index
    %c0_0 = arith.constant 0 : index
    %c0_1 = arith.constant 0 : index
    %0 = vector.load %arg1[%c0, %c0_0, %c0_1] : memref<1x8x656xf32, #tpu.memory_space<vmem>>, vector<1x8x656xf32>
    %1 = vector.shape_cast %0 : vector<1x8x656xf32> to vector<8x656xf32>
    %c0_2 = arith.constant 0 : index
    %c0_3 = arith.constant 0 : index
    %2 = vector.load %arg2[%c0_2, %c0_3] : memref<1x400xf32, #tpu.memory_space<vmem>>, vector<1x400xf32>
    %cst = arith.constant 0.707106769 : f32
    %3 = vector.broadcast %cst : f32 to vector<1x400xf32>
    %4 = arith.mulf %2, %3 : vector<1x400xf32>
    %cst_4 = arith.constant 0.000000e+00 : f32
    %5 = vector.broadcast %cst_4 : f32 to vector<8x128xf32>
    %cst_5 = arith.constant 0.000000e+00 : f32
    %6 = vector.broadcast %cst_5 : f32 to vector<8x128xf32>
    %cst_6 = arith.constant 0.000000e+00 : f32
    %7 = vector.broadcast %cst_6 : f32 to vector<8x400xf32>
    %c0_7 = arith.constant 0 : index
    %c0_8 = arith.constant 0 : index
    %c0_9 = arith.constant 0 : index
    %8 = vector.load %arg3[%c0_7, %c0_8, %c0_9] : memref<2x16x72xbf16, #tpu.memory_space<vmem>>, vector<1x16x72xbf16>
    %9 = vector.shape_cast %8 : vector<1x16x72xbf16> to vector<16x72xbf16>
    %10 = vector.extract_strided_slice %1 {offsets = [0, 107], sizes = [8, 400], strides = [1, 1]} : vector<8x656xf32> to vector<8x400xf32>
    %11 = vector.extract_strided_slice %1 {offsets = [0, 108], sizes = [8, 400], strides = [1, 1]} : vector<8x656xf32> to vector<8x400xf32>
    %12 = vector.extract_strided_slice %1 {offsets = [0, 109], sizes = [8, 400], strides = [1, 1]} : vector<8x656xf32> to vector<8x400xf32>
    %13 = vector.extract_strided_slice %1 {offsets = [0, 127], sizes = [8, 400], strides = [1, 1]} : vector<8x656xf32> to vector<8x400xf32>
    %14 = vector.extract_strided_slice %1 {offsets = [0, 128], sizes = [8, 400], strides = [1, 1]} : vector<8x656xf32> to vector<8x400xf32>
    %15 = vector.extract_strided_slice %1 {offsets = [0, 129], sizes = [8, 400], strides = [1, 1]} : vector<8x656xf32> to vector<8x400xf32>
    %16 = vector.extract_strided_slice %1 {offsets = [0, 147], sizes = [8, 400], strides = [1, 1]} : vector<8x656xf32> to vector<8x400xf32>
    %17 = vector.extract_strided_slice %1 {offsets = [0, 148], sizes = [8, 400], strides = [1, 1]} : vector<8x656xf32> to vector<8x400xf32>
    %18 = vector.extract_strided_slice %1 {offsets = [0, 149], sizes = [8, 400], strides = [1, 1]} : vector<8x656xf32> to vector<8x400xf32>
    %19 = tpu.concatenate %10, %11, %12, %13, %14, %15, %16, %17, %18 in 0 : vector<8x400xf32>, vector<8x400xf32>, vector<8x400xf32>, vector<8x400xf32>, vector<8x400xf32>, vector<8x400xf32>, vector<8x400xf32>, vector<8x400xf32>, vector<8x400xf32> -> vector<72x400xf32>
    %20 = arith.truncf %19 : vector<72x400xf32> to vector<72x400xbf16>
    %cst_10 = arith.constant dense<0.000000e+00> : vector<16x400xf32>
    %21 = tpu.matmul %9, %20, %cst_10 {dimension_numbers = #tpu.dot_dimension_numbers<[1], [0], [0], [1], [0, 0, 1, 1], [], []>} : vector<16x72xbf16>, vector<72x400xbf16>, vector<16x400xf32> -> vector<16x400xf32>
    %c0_11 = arith.constant 0 : index
    %c0_12 = arith.constant 0 : index
    %c0_13 = arith.constant 0 : index
    %22 = vector.load %arg4[%c0_11, %c0_12, %c0_13] : memref<2x16x1xf32, #tpu.memory_space<vmem>>, vector<1x16x1xf32>
    %23 = vector.shape_cast %22 : vector<1x16x1xf32> to vector<16x1xf32>
    %24 = vector.broadcast %23 : vector<16x1xf32> to vector<16x400xf32>
    %25 = arith.addf %21, %24 : vector<16x400xf32>
    %26 = vector.extract_strided_slice %25 {offsets = [0, 0], sizes = [8, 400], strides = [1, 1]} : vector<16x400xf32> to vector<8x400xf32>
    %27 = math.tanh %26 : vector<8x400xf32>
    %28 = vector.extract_strided_slice %25 {offsets = [8, 0], sizes = [8, 400], strides = [1, 1]} : vector<16x400xf32> to vector<8x400xf32>
    %29 = arith.negf %28 : vector<8x400xf32>
    %30 = math.exp %29 : vector<8x400xf32>
    %cst_14 = arith.constant 1.000000e+00 : f32
    %31 = vector.broadcast %cst_14 : f32 to vector<8x400xf32>
    %32 = arith.addf %31, %30 : vector<8x400xf32>
    %33 = arith.divf %31, %32 : vector<8x400xf32>
    %34 = arith.mulf %27, %33 : vector<8x400xf32>
    %35 = vector.broadcast %2 : vector<1x400xf32> to vector<8x400xf32>
    %36 = arith.mulf %34, %35 : vector<8x400xf32>
    %37 = tpu.concatenate %6, %36, %6 in 1 : vector<8x128xf32>, vector<8x400xf32>, vector<8x128xf32> -> vector<8x656xf32>
    %c0_15 = arith.constant 0 : index
    %c0_16 = arith.constant 0 : index
    %c0_17 = arith.constant 0 : index
    %38 = vector.load %arg5[%c0_15, %c0_16, %c0_17] : memref<2x16x72xbf16, #tpu.memory_space<vmem>>, vector<1x16x72xbf16>
    %39 = vector.shape_cast %38 : vector<1x16x72xbf16> to vector<16x72xbf16>
    %40 = vector.extract_strided_slice %37 {offsets = [0, 107], sizes = [8, 400], strides = [1, 1]} : vector<8x656xf32> to vector<8x400xf32>
    %41 = vector.extract_strided_slice %37 {offsets = [0, 108], sizes = [8, 400], strides = [1, 1]} : vector<8x656xf32> to vector<8x400xf32>
    %42 = vector.extract_strided_slice %37 {offsets = [0, 109], sizes = [8, 400], strides = [1, 1]} : vector<8x656xf32> to vector<8x400xf32>
    %43 = vector.extract_strided_slice %37 {offsets = [0, 127], sizes = [8, 400], strides = [1, 1]} : vector<8x656xf32> to vector<8x400xf32>
    %44 = vector.extract_strided_slice %37 {offsets = [0, 128], sizes = [8, 400], strides = [1, 1]} : vector<8x656xf32> to vector<8x400xf32>
    %45 = vector.extract_strided_slice %37 {offsets = [0, 129], sizes = [8, 400], strides = [1, 1]} : vector<8x656xf32> to vector<8x400xf32>
    %46 = vector.extract_strided_slice %37 {offsets = [0, 147], sizes = [8, 400], strides = [1, 1]} : vector<8x656xf32> to vector<8x400xf32>
    %47 = vector.extract_strided_slice %37 {offsets = [0, 148], sizes = [8, 400], strides = [1, 1]} : vector<8x656xf32> to vector<8x400xf32>
    %48 = vector.extract_strided_slice %37 {offsets = [0, 149], sizes = [8, 400], strides = [1, 1]} : vector<8x656xf32> to vector<8x400xf32>
    %49 = tpu.concatenate %40, %41, %42, %43, %44, %45, %46, %47, %48 in 0 : vector<8x400xf32>, vector<8x400xf32>, vector<8x400xf32>, vector<8x400xf32>, vector<8x400xf32>, vector<8x400xf32>, vector<8x400xf32>, vector<8x400xf32>, vector<8x400xf32> -> vector<72x400xf32>
    %50 = arith.truncf %49 : vector<72x400xf32> to vector<72x400xbf16>
    %cst_18 = arith.constant dense<0.000000e+00> : vector<16x400xf32>
    %51 = tpu.matmul %39, %50, %cst_18 {dimension_numbers = #tpu.dot_dimension_numbers<[1], [0], [0], [1], [0, 0, 1, 1], [], []>} : vector<16x72xbf16>, vector<72x400xbf16>, vector<16x400xf32> -> vector<16x400xf32>
    %c0_19 = arith.constant 0 : index
    %c0_20 = arith.constant 0 : index
    %c0_21 = arith.constant 0 : index
    %52 = vector.load %arg6[%c0_19, %c0_20, %c0_21] : memref<2x16x1xf32, #tpu.memory_space<vmem>>, vector<1x16x1xf32>
    %53 = vector.shape_cast %52 : vector<1x16x1xf32> to vector<16x1xf32>
    %54 = vector.broadcast %53 : vector<16x1xf32> to vector<16x400xf32>
    %55 = arith.addf %51, %54 : vector<16x400xf32>
    %56 = vector.extract_strided_slice %55 {offsets = [0, 0], sizes = [8, 400], strides = [1, 1]} : vector<16x400xf32> to vector<8x400xf32>
    %57 = arith.addf %7, %56 : vector<8x400xf32>
    %58 = vector.extract_strided_slice %1 {offsets = [0, 128], sizes = [8, 400], strides = [1, 1]} : vector<8x656xf32> to vector<8x400xf32>
    %59 = vector.extract_strided_slice %55 {offsets = [8, 0], sizes = [8, 400], strides = [1, 1]} : vector<16x400xf32> to vector<8x400xf32>
    %60 = arith.addf %58, %59 : vector<8x400xf32>
    %61 = vector.broadcast %4 : vector<1x400xf32> to vector<8x400xf32>
    %62 = arith.mulf %60, %61 : vector<8x400xf32>
    %63 = tpu.concatenate %5, %62, %5 in 1 : vector<8x128xf32>, vector<8x400xf32>, vector<8x128xf32> -> vector<8x656xf32>
    %c1 = arith.constant 1 : index
    %c0_22 = arith.constant 0 : index
    %c0_23 = arith.constant 0 : index
    %64 = vector.load %arg3[%c1, %c0_22, %c0_23] : memref<2x16x72xbf16, #tpu.memory_space<vmem>>, vector<1x16x72xbf16>
    %65 = vector.shape_cast %64 : vector<1x16x72xbf16> to vector<16x72xbf16>
    %66 = vector.extract_strided_slice %63 {offsets = [0, 86], sizes = [8, 400], strides = [1, 1]} : vector<8x656xf32> to vector<8x400xf32>
    %67 = vector.extract_strided_slice %63 {offsets = [0, 88], sizes = [8, 400], strides = [1, 1]} : vector<8x656xf32> to vector<8x400xf32>
    %68 = vector.extract_strided_slice %63 {offsets = [0, 90], sizes = [8, 400], strides = [1, 1]} : vector<8x656xf32> to vector<8x400xf32>
    %69 = vector.extract_strided_slice %63 {offsets = [0, 126], sizes = [8, 400], strides = [1, 1]} : vector<8x656xf32> to vector<8x400xf32>
    %70 = vector.extract_strided_slice %63 {offsets = [0, 128], sizes = [8, 400], strides = [1, 1]} : vector<8x656xf32> to vector<8x400xf32>
    %71 = vector.extract_strided_slice %63 {offsets = [0, 130], sizes = [8, 400], strides = [1, 1]} : vector<8x656xf32> to vector<8x400xf32>
    %72 = vector.extract_strided_slice %63 {offsets = [0, 166], sizes = [8, 400], strides = [1, 1]} : vector<8x656xf32> to vector<8x400xf32>
    %73 = vector.extract_strided_slice %63 {offsets = [0, 168], sizes = [8, 400], strides = [1, 1]} : vector<8x656xf32> to vector<8x400xf32>
    %74 = vector.extract_strided_slice %63 {offsets = [0, 170], sizes = [8, 400], strides = [1, 1]} : vector<8x656xf32> to vector<8x400xf32>
    %75 = tpu.concatenate %66, %67, %68, %69, %70, %71, %72, %73, %74 in 0 : vector<8x400xf32>, vector<8x400xf32>, vector<8x400xf32>, vector<8x400xf32>, vector<8x400xf32>, vector<8x400xf32>, vector<8x400xf32>, vector<8x400xf32>, vector<8x400xf32> -> vector<72x400xf32>
    %76 = arith.truncf %75 : vector<72x400xf32> to vector<72x400xbf16>
    %cst_24 = arith.constant dense<0.000000e+00> : vector<16x400xf32>
    %77 = tpu.matmul %65, %76, %cst_24 {dimension_numbers = #tpu.dot_dimension_numbers<[1], [0], [0], [1], [0, 0, 1, 1], [], []>} : vector<16x72xbf16>, vector<72x400xbf16>, vector<16x400xf32> -> vector<16x400xf32>
    %c1_25 = arith.constant 1 : index
    %c0_26 = arith.constant 0 : index
    %c0_27 = arith.constant 0 : index
    %78 = vector.load %arg4[%c1_25, %c0_26, %c0_27] : memref<2x16x1xf32, #tpu.memory_space<vmem>>, vector<1x16x1xf32>
    %79 = vector.shape_cast %78 : vector<1x16x1xf32> to vector<16x1xf32>
    %80 = vector.broadcast %79 : vector<16x1xf32> to vector<16x400xf32>
    %81 = arith.addf %77, %80 : vector<16x400xf32>
    %82 = vector.extract_strided_slice %81 {offsets = [0, 0], sizes = [8, 400], strides = [1, 1]} : vector<16x400xf32> to vector<8x400xf32>
    %83 = math.tanh %82 : vector<8x400xf32>
    %84 = vector.extract_strided_slice %81 {offsets = [8, 0], sizes = [8, 400], strides = [1, 1]} : vector<16x400xf32> to vector<8x400xf32>
    %85 = arith.negf %84 : vector<8x400xf32>
    %86 = math.exp %85 : vector<8x400xf32>
    %cst_28 = arith.constant 1.000000e+00 : f32
    %87 = vector.broadcast %cst_28 : f32 to vector<8x400xf32>
    %88 = arith.addf %87, %86 : vector<8x400xf32>
    %89 = arith.divf %87, %88 : vector<8x400xf32>
    %90 = arith.mulf %83, %89 : vector<8x400xf32>
    %91 = vector.broadcast %2 : vector<1x400xf32> to vector<8x400xf32>
    %92 = arith.mulf %90, %91 : vector<8x400xf32>
    %93 = tpu.concatenate %6, %92, %6 in 1 : vector<8x128xf32>, vector<8x400xf32>, vector<8x128xf32> -> vector<8x656xf32>
    %c1_29 = arith.constant 1 : index
    %c0_30 = arith.constant 0 : index
    %c0_31 = arith.constant 0 : index
    %94 = vector.load %arg5[%c1_29, %c0_30, %c0_31] : memref<2x16x72xbf16, #tpu.memory_space<vmem>>, vector<1x16x72xbf16>
    %95 = vector.shape_cast %94 : vector<1x16x72xbf16> to vector<16x72xbf16>
    %96 = vector.extract_strided_slice %93 {offsets = [0, 107], sizes = [8, 400], strides = [1, 1]} : vector<8x656xf32> to vector<8x400xf32>
    %97 = vector.extract_strided_slice %93 {offsets = [0, 108], sizes = [8, 400], strides = [1, 1]} : vector<8x656xf32> to vector<8x400xf32>
    %98 = vector.extract_strided_slice %93 {offsets = [0, 109], sizes = [8, 400], strides = [1, 1]} : vector<8x656xf32> to vector<8x400xf32>
    %99 = vector.extract_strided_slice %93 {offsets = [0, 127], sizes = [8, 400], strides = [1, 1]} : vector<8x656xf32> to vector<8x400xf32>
    %100 = vector.extract_strided_slice %93 {offsets = [0, 128], sizes = [8, 400], strides = [1, 1]} : vector<8x656xf32> to vector<8x400xf32>
    %101 = vector.extract_strided_slice %93 {offsets = [0, 129], sizes = [8, 400], strides = [1, 1]} : vector<8x656xf32> to vector<8x400xf32>
    %102 = vector.extract_strided_slice %93 {offsets = [0, 147], sizes = [8, 400], strides = [1, 1]} : vector<8x656xf32> to vector<8x400xf32>
    %103 = vector.extract_strided_slice %93 {offsets = [0, 148], sizes = [8, 400], strides = [1, 1]} : vector<8x656xf32> to vector<8x400xf32>
    %104 = vector.extract_strided_slice %93 {offsets = [0, 149], sizes = [8, 400], strides = [1, 1]} : vector<8x656xf32> to vector<8x400xf32>
    %105 = tpu.concatenate %96, %97, %98, %99, %100, %101, %102, %103, %104 in 0 : vector<8x400xf32>, vector<8x400xf32>, vector<8x400xf32>, vector<8x400xf32>, vector<8x400xf32>, vector<8x400xf32>, vector<8x400xf32>, vector<8x400xf32>, vector<8x400xf32> -> vector<72x400xf32>
    %106 = arith.truncf %105 : vector<72x400xf32> to vector<72x400xbf16>
    %cst_32 = arith.constant dense<0.000000e+00> : vector<16x400xf32>
    %107 = tpu.matmul %95, %106, %cst_32 {dimension_numbers = #tpu.dot_dimension_numbers<[1], [0], [0], [1], [0, 0, 1, 1], [], []>} : vector<16x72xbf16>, vector<72x400xbf16>, vector<16x400xf32> -> vector<16x400xf32>
    %c1_33 = arith.constant 1 : index
    %c0_34 = arith.constant 0 : index
    %c0_35 = arith.constant 0 : index
    %108 = vector.load %arg6[%c1_33, %c0_34, %c0_35] : memref<2x16x1xf32, #tpu.memory_space<vmem>>, vector<1x16x1xf32>
    %109 = vector.shape_cast %108 : vector<1x16x1xf32> to vector<16x1xf32>
    %110 = vector.broadcast %109 : vector<16x1xf32> to vector<16x400xf32>
    %111 = arith.addf %107, %110 : vector<16x400xf32>
    %112 = vector.extract_strided_slice %111 {offsets = [0, 0], sizes = [8, 400], strides = [1, 1]} : vector<16x400xf32> to vector<8x400xf32>
    %113 = arith.addf %57, %112 : vector<8x400xf32>
    %cst_36 = arith.constant 0.707106769 : f32
    %114 = vector.broadcast %cst_36 : f32 to vector<8x400xf32>
    %115 = arith.mulf %113, %114 : vector<8x400xf32>
    %c0_37 = arith.constant 0 : index
    %c0_38 = arith.constant 0 : index
    %c0_39 = arith.constant 0 : index
    %116 = vector.load %arg7[%c0_37, %c0_38, %c0_39] : memref<1x8x400xf32, #tpu.memory_space<vmem>>, vector<1x8x400xf32>
    %117 = vector.shape_cast %116 : vector<1x8x400xf32> to vector<8x400xf32>
    %118 = vector.shape_cast %115 : vector<8x400xf32> to vector<1x8x400xf32>
    tpu.vector_store %arg7[%c0_37, %c0_38, %c0_39], %118 {strides = array<i32>} : memref<1x8x400xf32, #tpu.memory_space<vmem>>, vector<1x8x400xf32>,
    return
  }
  func.func @transform_0(%arg0: i32) -> (i32, i32, i32) {
    %c0_i32 = arith.constant 0 : i32
    %c0_i32_0 = arith.constant 0 : i32
    %c0_i32_1 = arith.constant 0 : i32
    return %arg0, %c0_i32, %c0_i32_0 : i32, i32, i32
  }
  func.func @transform_1(%arg0: i32) -> (i32, i32) {
    %c0_i32 = arith.constant 0 : i32
    %c0_i32_0 = arith.constant 0 : i32
    %c0_i32_1 = arith.constant 0 : i32
    return %c0_i32, %c0_i32_0 : i32, i32
  }
  func.func @transform_2(%arg0: i32) -> (i32, i32, i32) {
    %c0_i32 = arith.constant 0 : i32
    %c0_i32_0 = arith.constant 0 : i32
    %c0_i32_1 = arith.constant 0 : i32
    %c0_i32_2 = arith.constant 0 : i32
    return %c0_i32, %c0_i32_0, %c0_i32_1 : i32, i32, i32
  }
  func.func @transform_3(%arg0: i32) -> (i32, i32, i32) {
    %c0_i32 = arith.constant 0 : i32
    %c0_i32_0 = arith.constant 0 : i32
    %c0_i32_1 = arith.constant 0 : i32
    %c0_i32_2 = arith.constant 0 : i32
    return %c0_i32, %c0_i32_0, %c0_i32_1 : i32, i32, i32
  }
  func.func @transform_4(%arg0: i32) -> (i32, i32, i32) {
    %c0_i32 = arith.constant 0 : i32
    %c0_i32_0 = arith.constant 0 : i32
    %c0_i32_1 = arith.constant 0 : i32
    %c0_i32_2 = arith.constant 0 : i32
    return %c0_i32, %c0_i32_0, %c0_i32_1 : i32, i32, i32
  }
  func.func @transform_5(%arg0: i32) -> (i32, i32, i32) {
    %c0_i32 = arith.constant 0 : i32
    %c0_i32_0 = arith.constant 0 : i32
    %c0_i32_1 = arith.constant 0 : i32
    %c0_i32_2 = arith.constant 0 : i32
    return %c0_i32, %c0_i32_0, %c0_i32_1 : i32, i32, i32
  }
  func.func @transform_6(%arg0: i32) -> (i32, i32, i32) {
    %c0_i32 = arith.constant 0 : i32
    %c0_i32_0 = arith.constant 0 : i32
    %c0_i32_1 = arith.constant 0 : i32
    return %arg0, %c0_i32, %c0_i32_0 : i32, i32, i32
  }
}

</mosaic_0001>

<bundles_post_ra>
// kernel: _lambda_.1
= control target key start
LH: loop header
LB: loop body
LE: loop exit
PB: predicated region body
PF: predicated region fallthrough
CT: control target
= control target key end

     0   :  { %s2395_s21 = smov 0   ;;  %s3054_s0 = inlined_call_operand.vmem [shape: f32[2,8,656], index: 0, kind: input, shape index: {}]   ;;  %s3055_s1 = inlined_call_operand.vmem [shape: f32[1,400], index: 1, kind: input, shape index: {}]   ;;  %s3056_s2 = inlined_call_operand.vmem [shape: bf16[2,16,72], index: 2, kind: input, shape index: {}]   ;;  %s3057_s3 = inlined_call_operand.vmem [shape: f32[2,16,1], index: 3, kind: input, shape index: {}]   ;;  %s3058_s4 = inlined_call_operand.vmem [shape: bf16[2,16,72], index: 4, kind: input, shape index: {}]   ;;  %s3059_s5 = inlined_call_operand.vmem [shape: f32[2,16,1], index: 5, kind: input, shape index: {}]   ;;  %s3060_s6 = inlined_call_operand.vmem [shape: f32[2,8,400], index: 6, kind: output, shape index: {}]  }
   0x1 LB: > { %s1899_s22 = sadd.s32 4294967295, %s2341_s21   ;;  %p1903_p0 = scmp.ge.s32.totalorder %s2341_s21, 1  ;;  %s2341_s21 = sphi %s2395_s21, %s16_s21  }
   0x2   : > { %p212_p1 = scmp.lt.s32.totalorder %s2341_s21, 3 }
   0x4   : > { %p213_p2 = pnand %p1903_p0, %p212_p1 }
   0x5   : > { %p242_p3 = scmp.lt.s32.totalorder (!%p213_p2), %s1899_s22, 1  ;;  %s2343_s27 = smov (!%p213_p2), 86  }
   0x6   : > { %216 = sbr.rel (%p213_p2) target bundleno = 2043 (0x7fb), region = 44  ;;  %s2344_s28 = smov (!%p213_p2), 88  }
   0x7   : > { %s2345_s29 = smov (!%p213_p2), 87   ;;  %s2346_s30 = smov (!%p213_p2), 107  }
   0x8   : > { %s2347_s7 = smov (!%p213_p2), 106   ;;  %s2348_s8 = smov (!%p213_p2), 126  }
   0x9   : > { %s2349_s9 = smov (!%p213_p2), 108   ;;  %s2350_s10 = smov (!%p213_p2), 127  }
   0xa   : > { %s2351_s11 = smov (!%p213_p2), 21   ;;  %s2354_s12 = smov (!%p213_p2), 124  }
   0xb   : > { %s3077_s22 = smov (!%p242_p3, %s1899_s22), 1  ;;  %vm390_vm0 = vcmask 703488   ;;  %vm358_vm1 = vcmask 719872   ;;  %vm374_vm2 = vcmask 711680   ;;  %vm342_vm3 = vcmask 867328   ;;  %s2355_s13 = smov 44  }
   0xc   : > { %s1946_s23 = smul.u32 48, %s3077_s22  ;;  %vm326_vm4 = vcmask 875520   ;;  %vm290_vm5 = vcmask 1031168   ;;  %vm309_vm6 = vcmask 883712   ;;  %vm274_vm7 = vcmask 1039360   ;;  %s2357_s14 = smov 46  }
   0xd   : > { %vm531_vm8 = vcmask 1043456   ;;  %vm3061_vm9 = vcmask 171008   ;;  %vm527_vm10 = vcmask 588800   ;;  %vm687_vm11 = vcmask 130048   ;;  %s2358_s15 = smov 84   ;;  %s2359_s16 = smov 42  }
   0xe   : > { %s2409_s26 = scalar_lea.vmem %s3054_s0, %s1946_s23  ;;  %vm1207_vm12 = vcmask 359424   ;;  %vm1175_vm13 = vcmask 392192   ;;  %vm1191_vm14 = vcmask 375808   ;;  %vm1159_vm15 = vcmask 687104  }
   0xf   : > { %v2412_v0 = vld [vmem:[%s2409_s26 + $0x10] sm:$0xff]  ;;  %v2415_v1 = vld [vmem:[%s2409_s26 + $0x18] sm:$0xff]  ;;  %v2418_v2 = vld [vmem:[%s2409_s26 + $0x8] sm:$0xff] }
  0x10   : > { %v1972_v3 = vpack.i.bf16 %v2415_v1, %v2412_v0  ;;  %v1982_v4 = vpack.i.bf16 %v2412_v0, %v2418_v2  ;;  %v257_v5 = vld [vmem:[%s2409_s26 + $0x20] sm:$0xff] }
  0x11   : > { %v1987_v6 = vpack.i.bf16 %v257_v5, %v2415_v1  ;;  %v1977_v7 = vpack.i.bf16 %v2418_v2, %v257_v5  ;;  %v2436_v8 = vld [vmem:[%s2409_s26] sm:$0xff] }
  0x12   : > { %1973 = vrot.lane.b32.xlu0 %v1972_v3, %s2343_s27  ;;  %1983 = vrot.lane.b32.xlu1 %v1982_v4, %s2344_s28  ;;  %v2027_v9 = vpack.i.bf16 %v2436_v8, %v2415_v1 }
  0x16   : > { %1988 = vrot.lane.b32.xlu1 %v1987_v6, %s2344_s28  ;;  %1978 = vrot.lane.b32.xlu0 %v1977_v7, %s2343_s27 }
  0x1a   : > { %1998 = vrot.lane.b32.xlu1 %v1987_v6, %s2345_s29  ;;  %1993 = vrot.lane.b32.xlu0 %v1982_v4, %s2345_s29 }
  0x1e   : > { %2008 = vrot.lane.b32.xlu1 %v1987_v6, %s2346_s30  ;;  %2003 = vrot.lane.b32.xlu0 %v1982_v4, %s2346_s30 }
  0x22   : > { %2018 = vrot.lane.b32.xlu1 %v1987_v6, %s2347_s7  ;;  %2013 = vrot.lane.b32.xlu0 %v1982_v4, %s2347_s7 }
  0x26   : > { %2023 = vrot.lane.b32.xlu0 %v1982_v4, %s2348_s8  ;;  %2028 = vrot.lane.b32.xlu1 %v2027_v9, %s2348_s8 }
  0x2a   : > { %2033 = vrot.lane.b32.xlu0 %v1982_v4, %s2349_s9  ;;  %2038 = vrot.lane.b32.xlu1 %v1987_v6, %s2349_s9 }
  0x2e   : > { %299 = vrot.lane.b32.xlu0 %v2436_v8, %s2349_s9  ;;  %2043 = vrot.lane.b32.xlu1 %v1982_v4, %s2350_s10 }
  0x32   : > { %2048 = vrot.lane.b32.xlu0 %v2027_v9, %s2350_s10 }
  0x84   : > { %v2450_v10 = vpop.permute.xlu0 %1973  ;;  %v2452_v11 = vpop.permute.xlu1 %1983 }
  0x85   : > { %v1976_v12 = vunpack.i.h.bf16 %v2450_v10  ;;  %v1975_v13 = vunpack.i.l.bf16 %v2450_v10  ;;  %v1985_v17 = vunpack.i.l.bf16 %v2452_v11  ;;  %v1986_v19 = vunpack.i.h.bf16 %v2452_v11 }
  0x87   : > { %v392_v22 = vsel %vm390_vm0, %v1975_v13, %v1976_v12  ;;  %v359_v33 = vsel %vm358_vm1, %v1985_v17, %v1986_v19 }
  0x88   : > { %v2456_v14 = vpop.permute.xlu1 %1988  ;;  %v1979_v15 = vpop.permute.xlu0 %1978  ;;  %v416_v30 = vpack.c.bf16 %v392_v22, %v392_v22 }
  0x89   : > { %v1981_v16 = vunpack.i.h.bf16 %v1979_v15  ;;  %v1991_v23 = vunpack.i.h.bf16 %v2456_v14  ;;  %v1990_v27 = vunpack.i.l.bf16 %v2456_v14  ;;  %v1980_v38 = vunpack.i.l.bf16 %v1979_v15 }
  0x8b   : > { %v414_v18 = vpack.c.bf16 %v1981_v16, %v1981_v16  ;;  %v361_v35 = vsel %vm358_vm1, %v1990_v27, %v1991_v23  ;;  %v393_v52 = vsel %vm390_vm0, %v1976_v12, %v1980_v38  ;;  %v391_v63 = vsel %vm390_vm0, %v1981_v16, %v1975_v13 }
  0x8c   : > { %v2460_v20 = vpop.permute.xlu1 %1998  ;;  %v2462_v21 = vpop.permute.xlu0 %1993  ;;  %v417_v60 = vpack.c.bf16 %v393_v52, %v393_v52  ;;  %v415_v14 = vpack.c.bf16 %v391_v63, %v391_v63  ;;  %v360_v10 = vsel %vm358_vm1, %v1986_v19, %v1990_v27 }
  0x8d   : > { %v2001_v24 = vunpack.i.h.bf16 %v2460_v20  ;;  %v1996_v25 = vunpack.i.h.bf16 %v2462_v21  ;;  %v1995_v26 = vunpack.i.l.bf16 %v2462_v21  ;;  %487 = vrot.lane.b32.xlu1 %v414_v18, %s2351_s11  ;;  %v2000_v28 = vunpack.i.l.bf16 %v2460_v20 }
  0x8f   : > { %v410_v29 = vpack.c.bf16 %v1995_v26, %v1985_v17  ;;  %v375_v34 = vsel %vm374_vm2, %v1995_v26, %v1996_v25  ;;  %v377_v36 = vsel %vm374_vm2, %v2000_v28, %v2001_v24  ;;  %v376_v13 = vsel %vm374_vm2, %v1996_v25, %v2000_v28 }
  0x90   : > { %v2474_v31 = vpop.permute.xlu1 %2008  ;;  %v2476_v32 = vpop.permute.xlu0 %2003  ;;  %v411_v37 = vpack.c.bf16 %v375_v34, %v359_v33  ;;  %v413_v41 = vpack.c.bf16 %v377_v36, %v361_v35  ;;  %v412_v24 = vpack.c.bf16 %v376_v13, %v360_v10  ;;  %v2352_v33 = vmov 0  }
  0x91   : > { %479 = vrot.lane.b32.xlu0 %v410_v29, %s2351_s11  ;;  %491 = vrot.lane.b32.xlu1 %v416_v30, %s2351_s11  ;;  %v2006_v42 = vunpack.i.h.bf16 %v2476_v32  ;;  %v2005_v43 = vunpack.i.l.bf16 %v2476_v32  ;;  %v2011_v46 = vunpack.i.h.bf16 %v2474_v31  ;;  %v2010_v49 = vunpack.i.l.bf16 %v2474_v31 }
  0x92   : > { %619 = vmatprep.mubr.bf16.mxu1 %v2352_v33  ;;  %576 = vmatprep.mubr.bf16.mxu0 %v2352_v33 }
  0x93   : > { %v327_v55 = vsel %vm326_vm4, %v2005_v43, %v2006_v42  ;;  %v329_v58 = vsel %vm326_vm4, %v2010_v49, %v2011_v46  ;;  %v328_v25 = vsel %vm326_vm4, %v2006_v42, %v2010_v49  ;;  %2053 = vset.pattern.permute.xlu0 %v2352_v33  ;;  %2052 = vset.pattern.permute.xlu1 %v2352_v33 }
  0x94   : > { %v2019_v39 = vpop.permute.xlu1 %2018  ;;  %v2014_v40 = vpop.permute.xlu0 %2013 }
  0x95   : > { %v2016_v44 = vunpack.i.h.bf16 %v2014_v40  ;;  %v2015_v45 = vunpack.i.l.bf16 %v2014_v40  ;;  %481 = vrot.lane.b32.xlu1 %v411_v37, %s2351_s11  ;;  %v2021_v47 = vunpack.i.h.bf16 %v2019_v39  ;;  %v2020_v50 = vunpack.i.l.bf16 %v2019_v39 }
  0x97   : > { %v406_v48 = vpack.c.bf16 %v2015_v45, %v2005_v43  ;;  %v343_v53 = vsel %vm342_vm3, %v2015_v45, %v2016_v44  ;;  %v345_v59 = vsel %vm342_vm3, %v2020_v50, %v2021_v47  ;;  %v344_v19 = vsel %vm342_vm3, %v2016_v44, %v2020_v50  ;;  %v418_v44 = vld [vmem:[%s3057_s3] sm:$0xff] }
  0x98   : > { %v2493_v51 = vpop.permute.xlu0 %2023  ;;  %v2029_v54 = vpop.permute.xlu1 %2028  ;;  %v407_v61 = vpack.c.bf16 %v343_v53, %v327_v55  ;;  %v409_v6 = vpack.c.bf16 %v345_v59, %v329_v58  ;;  %v408_v27 = vpack.c.bf16 %v344_v19, %v328_v25 }
  0x99   : > { %471 = vrot.lane.b32.xlu0 %v406_v48, %s2351_s11  ;;  %485 = vrot.lane.b32.xlu1 %v413_v41, %s2351_s11  ;;  %v2026_v56 = vunpack.i.h.bf16 %v2493_v51  ;;  %v2025_v57 = vunpack.i.l.bf16 %v2493_v51  ;;  %v2030_v23 = vunpack.i.l.bf16 %v2029_v54  ;;  %v2031_v28 = vunpack.i.h.bf16 %v2029_v54  ;;  %v419_v41 = vld [vmem:[%s3057_s3 + $0x8] sm:$0xff] }
  0x9b   : > { %v292_v12 = vsel %vm290_vm5, %v2025_v57, %v2026_v56  ;;  %v293_v30 = vsel %vm290_vm5, %v2026_v56, %v2030_v23  ;;  %v291_v36 = vsel %vm290_vm5, %v2031_v28, %v2025_v57 }
  0x9c   : > { %v2034_v62 = vpop.permute.xlu0 %2033  ;;  %v2039_v3 = vpop.permute.xlu1 %2038 }
  0x9d   : > { %493 = vrot.lane.b32.xlu0 %v417_v60, %s2351_s11  ;;  %473 = vrot.lane.b32.xlu1 %v407_v61, %s2351_s11  ;;  %v2036_v4 = vunpack.i.h.bf16 %v2034_v62  ;;  %v2035_v5 = vunpack.i.l.bf16 %v2034_v62  ;;  %v2041_v7 = vunpack.i.h.bf16 %v2039_v3  ;;  %v2040_v9 = vunpack.i.l.bf16 %v2039_v3 }
  0x9f   : > { %v311_v15 = vsel %vm309_vm6, %v2035_v5, %v2036_v4  ;;  %v313_v18 = vsel %vm309_vm6, %v2040_v9, %v2041_v7  ;;  %v312_v31 = vsel %vm309_vm6, %v2036_v4, %v2040_v9 }
  0xa0   : > { %v2044_v16 = vpop.permute.xlu1 %2043  ;;  %v403_v17 = vpack.c.bf16 %v311_v15, %v292_v12  ;;  %v300_v11 = vpop.permute.xlu0 %299  ;;  %v405_v21 = vpack.c.bf16 %v313_v18, %v2030_v23  ;;  %v404_v35 = vpack.c.bf16 %v312_v31, %v293_v30 }
  0xa1   : > { %489 = vrot.lane.b32.xlu0 %v415_v14, %s2351_s11  ;;  %477 = vrot.lane.b32.xlu1 %v409_v6, %s2351_s11  ;;  %v2046_v20 = vunpack.i.h.bf16 %v2044_v16  ;;  %v2045_v22 = vunpack.i.l.bf16 %v2044_v16  ;;  %v310_v37 = vsel %vm309_vm6, %v300_v11, %v2035_v5 }
  0xa2   : > { %v402_v38 = vpack.c.bf16 %v310_v37, %v291_v36 }
  0xa3   : > { %v276_v26 = vsel %vm274_vm7, %v2045_v22, %v2046_v20 }
  0xa4   : > { %v2049_v29 = vpop.permute.xlu0 %2048  ;;  %v399_v32 = vpack.c.bf16 %v276_v26, %v2418_v2 }
  0xa5   : > { %483 = vrot.lane.b32.xlu0 %v412_v24, %s2351_s11  ;;  %465 = vrot.lane.b32.xlu1 %v403_v17, %s2351_s11  ;;  %v2050_v34 = vunpack.i.l.bf16 %v2049_v29  ;;  %v2051_v39 = vunpack.i.h.bf16 %v2049_v29  ;;  %v2353_v24 = vmov 0.0  }
  0xa7   : > { %v401_v2 = vpack.c.bf16 %v2050_v34, %v2415_v1  ;;  %v277_v40 = vsel %vm274_vm7, %v2046_v20, %v2050_v34  ;;  %v275_v43 = vsel %vm274_vm7, %v2051_v39, %v2045_v22  ;;  %v2279_v20 = vld [vmem:[%s3056_s2] sm:$0xff]  }
  0xa8   : > { %v400_v42 = vpack.c.bf16 %v277_v40, %v2412_v0  ;;  %v398_v1 = vpack.c.bf16 %v275_v43, %v2436_v8 }
  0xa9   : > { %475 = vrot.lane.b32.xlu0 %v408_v27, %s2351_s11  ;;  %469 = vrot.lane.b32.xlu1 %v405_v21, %s2351_s11 }
  0xad   : > { %467 = vrot.lane.b32.xlu0 %v404_v35, %s2351_s11  ;;  %457 = vrot.lane.b32.xlu1 %v399_v32, %s2351_s11 }
  0xb1   : > { %463 = vrot.lane.b32.xlu0 %v402_v38, %s2351_s11  ;;  %461 = vrot.lane.b32.xlu1 %v401_v2, %s2351_s11 }
  0xb5   : > { %459 = vrot.lane.b32.xlu0 %v400_v42, %s2351_s11  ;;  %427 = vperm.xlu1 %2052, %v419_v41  }
  0xb9   : > { %455 = vrot.lane.b32.xlu0 %v398_v1, %s2351_s11 }
  0xbd   : > { %422 = vperm.xlu0 %2053, %v418_v44  }
  0xc1   : > { %726 = vrot.lane.b32.xlu0 %v2353_v24, %s2349_s9 }
  0xff   : > { %v488_v45 = vpop.permute.xlu1 %487 }
 0x103   : > { %v492_v46 = vpop.permute.xlu1 %491  ;;  %v480_v47 = vpop.permute.xlu0 %479 }
 0x107   : > { %v482_v48 = vpop.permute.xlu1 %481 }
 0x108   : > { %v505_v62 = vsel %vm3061_vm9, %v480_v47, %v482_v48 }
 0x10b   : > { %v472_v49 = vpop.permute.xlu0 %471  ;;  %v486_v0 = vpop.permute.xlu1 %485 }
 0x10f   : > { %v494_v50 = vpop.permute.xlu0 %493  ;;  %v474_v51 = vpop.permute.xlu1 %473 }
 0x110   : > { %1910 = vmatprep.subr.msk.bf16.mxu1 %vm531_vm8, %v494_v50  ;;  %v510_v8 = vsel %vm3061_vm9, %v492_v46, %v494_v50  ;;  %v502_v6 = vsel %vm3061_vm9, %v472_v49, %v474_v51 }
 0x111   : > { %v539_v52 = vsel %vm531_vm8, %v510_v8, 0 }
 0x112   : > { %594 = vmatpush1.bf16.msra.mxu1 %v539_v52  ;;  %v2587_v52 = vld [vmem:[%s3055_s1] sm:$0xf] }
 0x113   : > { %v490_v53 = vpop.permute.xlu0 %489  ;;  %595 = vmatprep.subr.bf16.mxu1 %v486_v0  ;;  %v478_v54 = vpop.permute.xlu1 %477 }
 0x114   : > { %v509_v55 = vsel %vm3061_vm9, %v490_v53, %v492_v46  ;;  %v508_v56 = vsel %vm3061_vm9, %v488_v45, %v490_v53  ;;  %v663_v45 = vlaneseq }
 0x115   : > { %1908 = vmatprep.subr.msk.bf16.mxu0 %vm531_vm8, %v509_v55  ;;  %v533_v57 = vsel %vm531_vm8, %v508_v56, 0 }
 0x116   : > { %551 = vmatpush1.bf16.msra.mxu0 %v533_v57  ;;  %v2581_v50 = vshrl.u32 %v663_v45, 7 }
 0x117   : > { %v484_v58 = vpop.permute.xlu0 %483  ;;  %v466_v59 = vpop.permute.xlu1 %465 }
 0x118   : > { %v506_v60 = vsel %vm3061_vm9, %v482_v48, %v484_v58  ;;  %v507_v61 = vsel %vm3061_vm9, %v484_v58, %v486_v0  ;;  %v673_v8 = vsub.s32 2, %v2581_v50  ;;  %v677_v56 = vsub.s32 3, %v2581_v50 }
 0x119   : > { %552 = vmatprep.subr.bf16.mxu0 %v506_v60  ;;  %596 = vmatpush1.bf16.msra.mxu1 %v507_v61  ;;  %v669_v60 = vsub.s32 1, %v2581_v50 }
 0x11a   : > { %553 = vmatpush1.bf16.msra.mxu0 %v505_v62  ;;  %597 = vmatprep.subr.bf16.mxu1 %v478_v54 }
 0x11b   : > { %v476_v63 = vpop.permute.xlu0 %475  ;;  %v470_v3 = vpop.permute.xlu1 %469 }
 0x11c   : > { %v503_v4 = vsel %vm3061_vm9, %v474_v51, %v476_v63  ;;  %v504_v5 = vsel %vm3061_vm9, %v476_v63, %v478_v54  ;;  %v2592_v54 = vrot.slane %v2587_v52, %v673_v8 }
 0x11d   : > { %554 = vmatprep.subr.bf16.mxu0 %v503_v4  ;;  %598 = vmatpush1.bf16.msra.mxu1 %v504_v5  ;;  %v2603_v5 = vrot.slane %v2587_v52, %v677_v56 }
 0x11e   : > { %555 = vmatpush1.bf16.msra.mxu0 %v502_v6  ;;  %599 = vmatprep.subr.bf16.mxu1 %v470_v3 }
 0x11f   : > { %v468_v7 = vpop.permute.xlu0 %467  ;;  %v458_v9 = vpop.permute.xlu1 %457 }
 0x120   : > { %v500_v12 = vsel %vm3061_vm9, %v466_v59, %v468_v7  ;;  %v501_v14 = vsel %vm3061_vm9, %v468_v7, %v470_v3 }
 0x121   : > { %556 = vmatprep.subr.bf16.mxu0 %v500_v12  ;;  %600 = vmatpush1.bf16.msra.mxu1 %v501_v14  ;;  %v2613_v12 = vrot.slane %v2587_v52, %v669_v60 }
 0x123   : > { %v464_v15 = vpop.permute.xlu0 %463  ;;  %v462_v10 = vpop.permute.xlu1 %461 }
 0x124   : > { %v499_v13 = vsel %vm3061_vm9, %v464_v15, %v466_v59  ;;  %601 = vmatprep.subr.bf16.mxu1 %v462_v10  ;;  %v665_v59 = vsub.s32 0, %v2581_v50 }
 0x125   : > { %557 = vmatpush1.bf16.msra.mxu0 %v499_v13 }
 0x127   : > { %v460_v16 = vpop.permute.xlu0 %459 }
 0x128   : > { %v497_v17 = vsel %vm3061_vm9, %v458_v9, %v460_v16  ;;  %v498_v18 = vsel %vm3061_vm9, %v460_v16, %v462_v10 }
 0x129   : > { %558 = vmatprep.subr.bf16.mxu0 %v497_v17  ;;  %602 = vmatpush1.bf16.msra.mxu1 %v498_v18 }
 0x12b   : > { %v456_v22 = vpop.permute.xlu0 %455 }
 0x12c   : > { %1911 = vmatmul.mubr.msk.bf16.vlgmr.msra.gmra.mxu1 %vm527_vm10, %v2279_v20  ;;  %v496_v23 = vsel %vm3061_vm9, %v456_v22, %v458_v9  ;;  %v2608_v9 = vrot.slane %v2587_v52, %v665_v59 }
 0x12d   : > { %559 = vmatpush1.bf16.msra.mxu0 %v496_v23  ;;  %1037 = vmatprep.mubr.bf16.mxu1 %v2352_v33 }
 0x130   : > { %1909 = vmatmul.mubr.msk.bf16.vlgmr.msra.gmra.mxu0 %vm527_vm10, %v2279_v20  ;;  %v428_v21 = vpop.permute.xlu1 %427 }
 0x131   : > { %994 = vmatprep.mubr.bf16.mxu0 %v2352_v33 }
 0x138   : > { %v423_v39 = vpop.permute.xlu0 %422 }
 0x1ec   : > { %v621_v11 = vpop.f32.mrf.mxu1 }
 0x1ed   : > { %v622_v40 = vadd.f32 %v621_v11, %v423_v39 }
 0x1ee   : > { %v623_v19 = vpop.f32.mrf.mxu1 }
 0x1ef   : > { %v624_v42 = vadd.f32 %v623_v19, %v423_v39  ;;  %v2647_v19 = vpop.permute.xlu0 %726 }
 0x1f0   : > { %v578_v25 = vpop.f32.mrf.mxu0  ;;  %v625_v26 = vpop.f32.mrf.mxu1 }
 0x1f1   : > { %v626_v27 = vadd.f32 %v625_v26, %v428_v21  ;;  %v579_v44 = vadd.f32 %v578_v25, %v423_v39 }
 0x1f2   : > { %v580_v28 = vpop.f32.mrf.mxu0  ;;  %v627_v29 = vpop.f32.mrf.mxu1 }
 0x1f3   : > { %v1914_v30 = vmul.f32 -1.442695, %v626_v27  ;;  %v628_v31 = vadd.f32 %v627_v29, %v428_v21  ;;  %v581_v48 = vadd.f32 %v580_v28, %v423_v39 }
 0x1f4   : > { %v582_v32 = vpop.f32.mrf.mxu0 }
 0x1f5   : > { %2283 = vpow2.f32 %v1914_v30  ;;  %v1915_v34 = vmul.f32 -1.442695, %v628_v31  ;;  %v583_v35 = vadd.f32 %v582_v32, %v428_v21 }
 0x1f6   : > { %v584_v36 = vpop.f32.mrf.mxu0 }
 0x1f7   : > { %2285 = vpow2.f32 %v1915_v34  ;;  %v1912_v37 = vmul.f32 -1.442695, %v583_v35  ;;  %v585_v2 = vadd.f32 %v584_v36, %v428_v21 }
 0x1f9   : > { %2287 = vpow2.f32 %v1912_v37  ;;  %v1913_v38 = vmul.f32 -1.442695, %v585_v2 }
 0x1fb   : > { %2289 = vpow2.f32 %v1913_v38 }
 0x1fc   : > { %2291 = vtanh.f32 %v622_v40 }
 0x202   : > { %v2284_v41 = vpop.eup %2283 }
 0x203   : > { %v648_v43 = vadd.f32 1.0, %v2284_v41 }
 0x204   : > { %v2286_v1 = vpop.eup %2285 }
 0x205   : > { %2293 = vrcp.f32 %v648_v43  ;;  %v649_v46 = vadd.f32 1.0, %v2286_v1 }
 0x206   : > { %v2288_v47 = vpop.eup %2287  ;;  %2295 = vtanh.f32 %v624_v42 }
 0x207   : > { %2297 = vrcp.f32 %v649_v46  ;;  %v646_v49 = vadd.f32 1.0, %v2288_v47 }
 0x208   : > { %v2290_v0 = vpop.eup %2289  ;;  %2299 = vtanh.f32 %v579_v44 }
 0x209   : > { %2301 = vrcp.f32 %v646_v49  ;;  %v647_v51 = vadd.f32 1.0, %v2290_v0  ;;  %v2292_v53 = vpop.eup %2291 }
 0x20a   : > { %2303 = vtanh.f32 %v581_v48 }
 0x20b   : > { %2305 = vrcp.f32 %v647_v51 }
 0x212   : > { %v2294_v55 = vpop.eup %2293 }
 0x213   : > { %v2296_v57 = vpop.eup %2295  ;;  %v660_v58 = vmul.f32 %v2294_v55, %v2292_v53 }
 0x214   : > { %v2298_v61 = vpop.eup %2297 }
 0x215   : > { %v2300_v62 = vpop.eup %2299  ;;  %v2598_v63 = vmul.f32 %v2592_v54, %v660_v58  ;;  %v661_v4 = vmul.f32 %v2298_v61, %v2296_v57 }
 0x216   : > { %v2302_v3 = vpop.eup %2301 }
 0x217   : > { %v2304_v6 = vpop.eup %2303  ;;  %v658_v7 = vmul.f32 %v2302_v3, %v2300_v62  ;;  %v2054_v14 = vpack.i.bf16 %v2353_v24, %v2598_v63  ;;  %v686_v13 = vmul.f32 %v2603_v5, %v661_v4 }
 0x218   : > { %v2306_v15 = vpop.eup %2305 }
 0x219   : > { %v659_v10 = vmul.f32 %v2306_v15, %v2304_v6  ;;  %2055 = vrot.lane.b32.xlu1 %v2054_v14, %s2348_s8  ;;  %v2620_v16 = vmul.f32 %v2608_v9, %v658_v7  ;;  %v688_v22 = vsel %vm687_vm11, %v686_v13, 0.0 }
 0x21a   : > { %v2099_v11 = vpack.i.bf16 %v688_v22, %v2598_v63 }
 0x21b   : > { %v2623_v17 = vmul.f32 %v2613_v12, %v659_v10  ;;  %v2094_v23 = vpack.i.bf16 %v2620_v16, %v688_v22 }
 0x21d   : > { %v2059_v18 = vpack.i.bf16 %v2598_v63, %v2623_v17  ;;  %v2064_v20 = vpack.i.bf16 %v2623_v17, %v2620_v16 }
 0x21f   : > { %2060 = vrot.lane.b32.xlu1 %v2059_v18, %s2343_s27  ;;  %2065 = vrot.lane.b32.xlu0 %v2064_v20, %s2344_s28 }
 0x223   : > { %2095 = vrot.lane.b32.xlu1 %v2094_v23, %s2343_s27  ;;  %2070 = vrot.lane.b32.xlu0 %v2064_v20, %s2345_s29 }
 0x227   : > { %2100 = vrot.lane.b32.xlu1 %v2099_v11, %s2344_s28  ;;  %2075 = vrot.lane.b32.xlu0 %v2064_v20, %s2346_s30 }
 0x22b   : > { %2105 = vrot.lane.b32.xlu1 %v2099_v11, %s2345_s29  ;;  %2080 = vrot.lane.b32.xlu0 %v2064_v20, %s2347_s7 }
 0x22f   : > { %2110 = vrot.lane.b32.xlu1 %v2099_v11, %s2346_s30  ;;  %2085 = vrot.lane.b32.xlu0 %v2064_v20, %s2348_s8 }
 0x233   : > { %2115 = vrot.lane.b32.xlu1 %v2099_v11, %s2347_s7  ;;  %2090 = vrot.lane.b32.xlu0 %v2064_v20, %s2349_s9 }
 0x237   : > { %2120 = vrot.lane.b32.xlu1 %v2099_v11, %s2349_s9  ;;  %2130 = vrot.lane.b32.xlu0 %v2054_v14, %s2350_s10 }
 0x23b   : > { %2125 = vrot.lane.b32.xlu1 %v2064_v20, %s2350_s10 }
 0x28b   : > { %v2649_v21 = vpop.permute.xlu1 %2055 }
 0x291   : > { %v2651_v25 = vpop.permute.xlu1 %2060  ;;  %v2066_v26 = vpop.permute.xlu0 %2065 }
 0x292   : > { %v2063_v27 = vunpack.i.h.bf16 %v2651_v25  ;;  %v2062_v28 = vunpack.i.l.bf16 %v2651_v25  ;;  %v2067_v31 = vunpack.i.l.bf16 %v2066_v26  ;;  %v2068_v41 = vunpack.i.h.bf16 %v2066_v26 }
 0x294   : > { %v813_v39 = vsel %vm390_vm0, %v2062_v28, %v2063_v27  ;;  %v782_v53 = vsel %vm358_vm1, %v2067_v31, %v2068_v41 }
 0x295   : > { %v2096_v29 = vpop.permute.xlu1 %2095  ;;  %v2071_v30 = vpop.permute.xlu0 %2070  ;;  %v837_v43 = vpack.c.bf16 %v813_v39, %v813_v39 }
 0x296   : > { %v2098_v32 = vunpack.i.h.bf16 %v2096_v29  ;;  %v2072_v34 = vunpack.i.l.bf16 %v2071_v30  ;;  %v2073_v37 = vunpack.i.h.bf16 %v2071_v30  ;;  %v2097_v20 = vunpack.i.l.bf16 %v2096_v29 }
 0x298   : > { %v835_v35 = vpack.c.bf16 %v2098_v32, %v2098_v32  ;;  %v831_v36 = vpack.c.bf16 %v2072_v34, %v2067_v31  ;;  %v812_v40 = vsel %vm390_vm0, %v2098_v32, %v2062_v28  ;;  %v797_v46 = vsel %vm374_vm2, %v2072_v34, %v2073_v37 }
 0x299   : > { %v2655_v2 = vpop.permute.xlu1 %2100  ;;  %v2076_v38 = vpop.permute.xlu0 %2075  ;;  %v836_v1 = vpack.c.bf16 %v812_v40, %v812_v40  ;;  %v832_v55 = vpack.c.bf16 %v797_v46, %v782_v53 }
 0x29a   : > { %908 = vrot.lane.b32.xlu1 %v835_v35, %s2351_s11  ;;  %900 = vrot.lane.b32.xlu0 %v831_v36, %s2351_s11  ;;  %v2102_v42 = vunpack.i.l.bf16 %v2655_v2  ;;  %v2078_v0 = vunpack.i.h.bf16 %v2076_v38  ;;  %v2077_v51 = vunpack.i.l.bf16 %v2076_v38  ;;  %v814_v35 = vsel %vm390_vm0, %v2063_v27, %v2097_v20 }
 0x29b   : > { %v838_v36 = vpack.c.bf16 %v814_v35, %v814_v35  ;;  %v2057_v27 = vunpack.i.l.bf16 %v2649_v21 }
 0x29c   : > { %v783_v57 = vsel %vm358_vm1, %v2068_v41, %v2102_v42  ;;  %v752_v6 = vsel %vm326_vm4, %v2077_v51, %v2078_v0  ;;  %v2103_v41 = vunpack.i.h.bf16 %v2655_v2 }
 0x29d   : > { %v2106_v44 = vpop.permute.xlu1 %2105  ;;  %v2081_v45 = vpop.permute.xlu0 %2080 }
 0x29e   : > { %v2107_v47 = vunpack.i.l.bf16 %v2106_v44  ;;  %v2083_v48 = vunpack.i.h.bf16 %v2081_v45  ;;  %v2082_v49 = vunpack.i.l.bf16 %v2081_v45  ;;  %912 = vrot.lane.b32.xlu1 %v837_v43, %s2351_s11  ;;  %910 = vrot.lane.b32.xlu0 %v836_v1, %s2351_s11 }
 0x2a0   : > { %v798_v58 = vsel %vm374_vm2, %v2073_v37, %v2107_v47  ;;  %v767_v4 = vsel %vm342_vm3, %v2082_v49, %v2083_v48  ;;  %v2108_v37 = vunpack.i.h.bf16 %v2106_v44  ;;  %v827_v1 = vpack.c.bf16 %v2082_v49, %v2077_v51 }
 0x2a1   : > { %v2111_v61 = vpop.permute.xlu1 %2110  ;;  %v2086_v62 = vpop.permute.xlu0 %2085  ;;  %v833_v3 = vpack.c.bf16 %v798_v58, %v783_v57  ;;  %v828_v10 = vpack.c.bf16 %v767_v4, %v752_v6  ;;  %v784_v49 = vsel %vm358_vm1, %v2102_v42, %v2103_v41  ;;  %v2698_v57 = vunpack.i.h.bf16 %v2649_v21 }
 0x2a2   : > { %902 = vrot.lane.b32.xlu1 %v832_v55, %s2351_s11  ;;  %v2112_v7 = vunpack.i.l.bf16 %v2111_v61  ;;  %v2088_v14 = vunpack.i.h.bf16 %v2086_v62  ;;  %v2087_v15 = vunpack.i.l.bf16 %v2086_v62  ;;  %v2113_v44 = vunpack.i.h.bf16 %v2111_v61 }
 0x2a3   : > { %904 = vrot.lane.b32.xlu0 %v833_v3, %s2351_s11 }
 0x2a4   : > { %v753_v25 = vsel %vm326_vm4, %v2078_v0, %v2112_v7  ;;  %v719_v28 = vsel %vm290_vm5, %v2087_v15, %v2088_v14  ;;  %v799_v0 = vsel %vm374_vm2, %v2107_v47, %v2108_v37  ;;  %v720_v53 = vsel %vm290_vm5, %v2088_v14, %v2057_v27 }
 0x2a5   : > { %v2116_v13 = vpop.permute.xlu1 %2115  ;;  %v2091_v18 = vpop.permute.xlu0 %2090  ;;  %v834_v55 = vpack.c.bf16 %v799_v0, %v784_v49  ;;  %v718_v42 = vsel %vm290_vm5, %v2698_v57, %v2087_v15  ;;  %v754_v61 = vsel %vm326_vm4, %v2112_v7, %v2113_v44 }
 0x2a6   : > { %v2117_v22 = vunpack.i.l.bf16 %v2116_v13  ;;  %v2093_v23 = vunpack.i.h.bf16 %v2091_v18  ;;  %v2092_v11 = vunpack.i.l.bf16 %v2091_v18  ;;  %894 = vrot.lane.b32.xlu1 %v828_v10, %s2351_s11  ;;  %v2118_v46 = vunpack.i.h.bf16 %v2116_v13 }
 0x2a8   : > { %v768_v26 = vsel %vm342_vm3, %v2083_v48, %v2117_v22  ;;  %v737_v30 = vsel %vm309_vm6, %v2092_v11, %v2093_v23  ;;  %v736_v47 = vsel %vm309_vm6, %v2647_v19, %v2092_v11  ;;  %v769_v62 = vsel %vm342_vm3, %v2117_v22, %v2118_v46 }
 0x2a9   : > { %v2121_v31 = vpop.permute.xlu1 %2120  ;;  %v829_v32 = vpack.c.bf16 %v768_v26, %v753_v25  ;;  %v824_v34 = vpack.c.bf16 %v737_v30, %v719_v28  ;;  %v2695_v51 = vpop.permute.xlu0 %2130  ;;  %v823_v3 = vpack.c.bf16 %v736_v47, %v718_v42  ;;  %v830_v21 = vpack.c.bf16 %v769_v62, %v754_v61  ;;  %v2280_v61 = vld [vmem:[%s3058_s4] sm:$0xff]  }
 0x2aa   : > { %v2122_v38 = vunpack.i.l.bf16 %v2121_v31  ;;  %v2123_v58 = vunpack.i.h.bf16 %v2121_v31  ;;  %v2132_v2 = vunpack.i.l.bf16 %v2695_v51  ;;  %v2133_v14 = vunpack.i.h.bf16 %v2695_v51  ;;  %v1936_v51 = vld [vmem:[%s3059_s5 + $0x10] sm:$0xff] }
 0x2ab   : > { %896 = vrot.lane.b32.xlu0 %v829_v32, %s2351_s11  ;;  %886 = vrot.lane.b32.xlu1 %v824_v34, %s2351_s11 }
 0x2ac   : > { %v738_v48 = vsel %vm309_vm6, %v2093_v23, %v2122_v38  ;;  %v739_v6 = vsel %vm309_vm6, %v2122_v38, %v2123_v58  ;;  %v822_v18 = vpack.c.bf16 %v2132_v2, %v2598_v63 }
 0x2ad   : > { %v2126_v29 = vpop.permute.xlu1 %2125  ;;  %v826_v13 = vpack.c.bf16 %v739_v6, %v2057_v27 }
 0x2ae   : > { %v2128_v39 = vunpack.i.h.bf16 %v2126_v29  ;;  %v2127_v40 = vunpack.i.l.bf16 %v2126_v29 }
 0x2af   : > { %914 = vrot.lane.b32.xlu0 %v838_v36, %s2351_s11 }
 0x2b0   : > { %v704_v43 = vsel %vm274_vm7, %v2127_v40, %v2128_v39  ;;  %v705_v4 = vsel %vm274_vm7, %v2128_v39, %v2132_v2  ;;  %v703_v15 = vsel %vm274_vm7, %v2133_v14, %v2127_v40 }
 0x2b1   : > { %v820_v45 = vpack.c.bf16 %v704_v43, %v2620_v16  ;;  %v825_v16 = vpack.c.bf16 %v738_v48, %v720_v53  ;;  %v821_v10 = vpack.c.bf16 %v705_v4, %v2623_v17  ;;  %v819_v7 = vpack.c.bf16 %v703_v15, %v2353_v24  ;;  %v840_v17 = vld [vmem:[%s3059_s5 + $0x8] sm:$0xff] }
 0x2b2   : > { %v259_v4 = vmul.f32 0.70710677, %v2587_v52 }
 0x2b3   : > { %892 = vrot.lane.b32.xlu0 %v827_v1, %s2351_s11  ;;  %878 = vrot.lane.b32.xlu1 %v820_v45, %s2351_s11 }
 0x2b7   : > { %888 = vrot.lane.b32.xlu0 %v825_v16, %s2351_s11  ;;  %906 = vrot.lane.b32.xlu1 %v834_v55, %s2351_s11 }
 0x2bb   : > { %884 = vrot.lane.b32.xlu0 %v823_v3, %s2351_s11  ;;  %898 = vrot.lane.b32.xlu1 %v830_v21, %s2351_s11 }
 0x2bf   : > { %880 = vrot.lane.b32.xlu0 %v821_v10, %s2351_s11  ;;  %890 = vrot.lane.b32.xlu1 %v826_v13, %s2351_s11 }
 0x2c3   : > { %876 = vrot.lane.b32.xlu0 %v819_v7, %s2351_s11  ;;  %882 = vrot.lane.b32.xlu1 %v822_v18, %s2351_s11 }
 0x2c7   : > { %848 = vperm.xlu1 %2052, %v840_v17   ;;  %1118 = vrot.lane.b32.xlu0 %v2353_v24, %s2344_s28 }
 0x30c   : > { %v909_v20 = vpop.permute.xlu1 %908  ;;  %v901_v22 = vpop.permute.xlu0 %900 }
 0x310   : > { %v913_v23 = vpop.permute.xlu1 %912  ;;  %v911_v11 = vpop.permute.xlu0 %910 }
 0x311   : > { %v928_v25 = vsel %vm3061_vm9, %v909_v20, %v911_v11  ;;  %v929_v63 = vsel %vm3061_vm9, %v911_v11, %v913_v23  ;;  %v1068_v20 = vrot.slane %v259_v4, %v673_v8  ;;  %v2331_v11 = vld [vmem:[%s2409_s26 + $0x18] sm:$0xff]  ;;  %v2333_v8 = vld [vmem:[%s2409_s26 + $0x10] sm:$0xff] }
 0x312   : > { %v951_v26 = vsel %vm531_vm8, %v928_v25, 0  ;;  %1917 = vmatprep.subr.msk.bf16.mxu0 %vm531_vm8, %v929_v63 }
 0x313   : > { %969 = vmatpush1.bf16.msra.mxu0 %v951_v26 }
 0x314   : > { %v903_v28 = vpop.permute.xlu1 %902 }
 0x315   : > { %v905_v30 = vpop.permute.xlu0 %904  ;;  %v925_v32 = vsel %vm3061_vm9, %v901_v22, %v903_v28 }
 0x316   : > { %v926_v31 = vsel %vm3061_vm9, %v903_v28, %v905_v30  ;;  %v1072_v28 = vrot.slane %v259_v4, %v677_v56 }
 0x317   : > { %970 = vmatprep.subr.bf16.mxu0 %v926_v31 }
 0x318   : > { %971 = vmatpush1.bf16.msra.mxu0 %v925_v32  ;;  %v895_v34 = vpop.permute.xlu1 %894  ;;  %v1060_v32 = vrot.slane %v259_v4, %v665_v59 }
 0x31d   : > { %v897_v35 = vpop.permute.xlu0 %896  ;;  %v887_v36 = vpop.permute.xlu1 %886 }
 0x31e   : > { %v923_v29 = vsel %vm3061_vm9, %v895_v34, %v897_v35 }
 0x31f   : > { %972 = vmatprep.subr.bf16.mxu0 %v923_v29  ;;  %v2334_v29 = vld [vmem:[%s2409_s26 + $0x20] sm:$0xff] }
 0x321   : > { %v915_v37 = vpop.permute.xlu0 %914 }
 0x322   : > { %v930_v38 = vsel %vm3061_vm9, %v913_v23, %v915_v37  ;;  %1919 = vmatprep.subr.msk.bf16.mxu1 %vm531_vm8, %v915_v37  ;;  %v1064_v23 = vrot.slane %v259_v4, %v669_v60 }
 0x323   : > { %v957_v39 = vsel %vm531_vm8, %v930_v38, 0 }
 0x324   : > { %1012 = vmatpush1.bf16.msra.mxu1 %v957_v39 }
 0x325   : > { %v893_v40 = vpop.permute.xlu0 %892  ;;  %v879_v41 = vpop.permute.xlu1 %878 }
 0x326   : > { %v922_v43 = vsel %vm3061_vm9, %v893_v40, %v895_v34 }
 0x327   : > { %973 = vmatpush1.bf16.msra.mxu0 %v922_v43 }
 0x329   : > { %v889_v1 = vpop.permute.xlu0 %888  ;;  %v907_v45 = vpop.permute.xlu1 %906 }
 0x32a   : > { %v927_v27 = vsel %vm3061_vm9, %v905_v30, %v907_v45  ;;  %1013 = vmatprep.subr.bf16.mxu1 %v907_v45  ;;  %v920_v46 = vsel %vm3061_vm9, %v887_v36, %v889_v1  ;;  %v2332_v30 = vld [vmem:[%s2409_s26 + $0x8] sm:$0xff]  ;;  %s2356_s26 = smov 48  }
 0x32b   : > { %974 = vmatprep.subr.bf16.mxu0 %v920_v46  ;;  %1014 = vmatpush1.bf16.msra.mxu1 %v927_v27 }
 0x32d   : > { %v885_v48 = vpop.permute.xlu0 %884  ;;  %v899_v0 = vpop.permute.xlu1 %898 }
 0x32e   : > { %v919_v44 = vsel %vm3061_vm9, %v885_v48, %v887_v36  ;;  %v924_v53 = vsel %vm3061_vm9, %v897_v35, %v899_v0  ;;  %1015 = vmatprep.subr.bf16.mxu1 %v899_v0 }
 0x32f   : > { %975 = vmatpush1.bf16.msra.mxu0 %v919_v44  ;;  %1016 = vmatpush1.bf16.msra.mxu1 %v924_v53 }
 0x331   : > { %v881_v49 = vpop.permute.xlu0 %880  ;;  %v891_v16 = vpop.permute.xlu1 %890 }
 0x332   : > { %v921_v55 = vsel %vm3061_vm9, %v889_v1, %v891_v16  ;;  %1017 = vmatprep.subr.bf16.mxu1 %v891_v16  ;;  %v917_v58 = vsel %vm3061_vm9, %v879_v41, %v881_v49 }
 0x333   : > { %976 = vmatprep.subr.bf16.mxu0 %v917_v58  ;;  %1018 = vmatpush1.bf16.msra.mxu1 %v921_v55 }
 0x335   : > { %v877_v47 = vpop.permute.xlu0 %876  ;;  %v883_v62 = vpop.permute.xlu1 %882 }
 0x336   : > { %v916_v2 = vsel %vm3061_vm9, %v877_v47, %v879_v41  ;;  %v918_v42 = vsel %vm3061_vm9, %v881_v49, %v883_v62  ;;  %1019 = vmatprep.subr.bf16.mxu1 %v883_v62  ;;  %vm1109_vm9 = vcmask 1014784  }
 0x337   : > { %977 = vmatpush1.bf16.msra.mxu0 %v916_v2  ;;  %1020 = vmatpush1.bf16.msra.mxu1 %v918_v42 }
 0x339   : > { %v2798_v43 = vpop.permute.xlu0 %1118 }
 0x33a   : > { %1918 = vmatmul.mubr.msk.bf16.vlgmr.msra.gmra.mxu0 %vm527_vm10, %v2280_v61  ;;  %1920 = vmatmul.mubr.msk.bf16.vlgmr.msra.gmra.mxu1 %vm527_vm10, %v2280_v61 }
 0x33b   : > { %1392 = vmatprep.mubr.bf16.mxu0 %v2352_v33  ;;  %1435 = vmatprep.mubr.bf16.mxu1 %v2352_v33 }
 0x342   : > { %v849_v13 = vpop.permute.xlu1 %848 }
 0x3fa   : > { %v2755_v3 = vpop.f32.mrf.mxu0  ;;  %v2757_v21 = vpop.f32.mrf.mxu1 }
 0x3fc   : > { %v2760_v6 = vpop.f32.mrf.mxu0  ;;  %v2762_v10 = vpop.f32.mrf.mxu1 }
 0x3fe   : > { %v1000_v15 = vpop.f32.mrf.mxu0  ;;  %v1043_v7 = vpop.f32.mrf.mxu1 }
 0x3ff   : > { %v1001_v18 = vadd.f32 %v1000_v15, %v849_v13  ;;  %v1044_v17 = vadd.f32 %v1043_v7, %v849_v13 }
 0x400   : > { %v1002_v22 = vpop.f32.mrf.mxu0  ;;  %v1045_v52 = vpop.f32.mrf.mxu1 }
 0x401   : > { %v1054_v25 = vadd.f32 %v2331_v11, %v1044_v17  ;;  %v1003_v63 = vadd.f32 %v1002_v22, %v849_v13  ;;  %v1046_v26 = vadd.f32 %v1045_v52, %v849_v13  ;;  %v1052_v31 = vadd.f32 %v2332_v30, %v1001_v18 }
 0x403   : > { %v2774_v34 = vmul.f32 %v1068_v20, %v1054_v25  ;;  %v1053_v35 = vadd.f32 %v2333_v8, %v1003_v63  ;;  %v1055_v36 = vadd.f32 %v2334_v29, %v1046_v26  ;;  %v2782_v39 = vmul.f32 %v1060_v32, %v1052_v31 }
 0x405   : > { %v2778_v60 = vmul.f32 %v1064_v23, %v1053_v35  ;;  %v1080_v37 = vmul.f32 %v1072_v28, %v1055_v36  ;;  %v2134_v38 = vpack.i.bf16 %v2353_v24, %v2774_v34 }
 0x407   : > { %v1081_v56 = vsel %vm687_vm11, %v1080_v37, 0.0  ;;  %2135 = vrot.lane.b32.xlu1 %v2134_v38, %s2354_s12  ;;  %v2139_v50 = vpack.i.bf16 %v2774_v34, %v2778_v60  ;;  %v2144_v40 = vpack.i.bf16 %v2778_v60, %v2782_v39 }
 0x408   : > { %v2174_v59 = vpack.i.bf16 %v2782_v39, %v1081_v56  ;;  %v2179_v41 = vpack.i.bf16 %v1081_v56, %v2774_v34 }
 0x409   : > { %2140 = vrot.lane.b32.xlu0 %v2139_v50, %s2355_s13 }
 0x40b   : > { %2175 = vrot.lane.b32.xlu1 %v2174_v59, %s2355_s13 }
 0x40d   : > { %2145 = vrot.lane.b32.xlu0 %v2144_v40, %s2356_s26 }
 0x40f   : > { %2180 = vrot.lane.b32.xlu1 %v2179_v41, %s2356_s26 }
 0x411   : > { %2150 = vrot.lane.b32.xlu0 %v2144_v40, %s2357_s14 }
 0x413   : > { %2185 = vrot.lane.b32.xlu1 %v2179_v41, %s2357_s14 }
 0x415   : > { %2155 = vrot.lane.b32.xlu0 %v2144_v40, %s2343_s27 }
 0x417   : > { %2190 = vrot.lane.b32.xlu1 %v2179_v41, %s2343_s27 }
 0x419   : > { %2160 = vrot.lane.b32.xlu0 %v2144_v40, %s2358_s15 }
 0x41b   : > { %2195 = vrot.lane.b32.xlu1 %v2179_v41, %s2358_s15 }
 0x41d   : > { %2165 = vrot.lane.b32.xlu0 %v2144_v40, %s2354_s12 }
 0x41f   : > { %2200 = vrot.lane.b32.xlu1 %v2179_v41, %s2344_s28 }
 0x421   : > { %2170 = vrot.lane.b32.xlu0 %v2144_v40, %s2344_s28 }
 0x423   : > { %2205 = vrot.lane.b32.xlu1 %v2144_v40, %s2348_s8 }
 0x425   : > { %1092 = vrot.lane.b32.xlu0 %v2774_v34, %s2348_s8 }
 0x479   : > { %v2800_v1 = vpop.permute.xlu1 %2135 }
 0x47b   : > { %v2141_v45 = vpop.permute.xlu0 %2140 }
 0x47c   : > { %v2143_v27 = vunpack.i.h.bf16 %v2141_v45  ;;  %v2142_v46 = vunpack.i.l.bf16 %v2141_v45 }
 0x47d   : > { %v2176_v48 = vpop.permute.xlu1 %2175 }
 0x47e   : > { %v2178_v0 = vunpack.i.h.bf16 %v2176_v48  ;;  %v1209_v16 = vsel %vm1207_vm12, %v2142_v46, %v2143_v27  ;;  %v2177_v38 = vunpack.i.l.bf16 %v2176_v48 }
 0x47f   : > { %v2146_v44 = vpop.permute.xlu0 %2145  ;;  %v1233_v42 = vpack.c.bf16 %v1209_v16, %v1209_v16 }
 0x480   : > { %v1231_v53 = vpack.c.bf16 %v2178_v0, %v2178_v0  ;;  %v2148_v55 = vunpack.i.h.bf16 %v2146_v44  ;;  %v2147_v58 = vunpack.i.l.bf16 %v2146_v44  ;;  %v1208_v20 = vsel %vm1207_vm12, %v2178_v0, %v2142_v46 }
 0x481   : > { %v2802_v49 = vpop.permute.xlu1 %2180  ;;  %v1232_v25 = vpack.c.bf16 %v1208_v20, %v1208_v20  ;;  %v1210_v44 = vsel %vm1207_vm12, %v2143_v27, %v2177_v38  ;;  %v2137_v20 = vunpack.i.l.bf16 %v2800_v1 }
 0x482   : > { %1305 = vrot.lane.b32.xlu1 %v1231_v53, %s2359_s16  ;;  %v1176_v4 = vsel %vm1175_vm13, %v2147_v58, %v2148_v55  ;;  %v2182_v22 = vunpack.i.l.bf16 %v2802_v49 }
 0x483   : > { %v2151_v47 = vpop.permute.xlu0 %2150 }
 0x484   : > { %v2153_v62 = vunpack.i.h.bf16 %v2151_v47  ;;  %v2152_v2 = vunpack.i.l.bf16 %v2151_v47  ;;  %v1177_v32 = vsel %vm1175_vm13, %v2148_v55, %v2182_v22 }
 0x485   : > { %v2806_v61 = vpop.permute.xlu1 %2185 }
 0x486   : > { %v1192_v13 = vsel %vm1191_vm14, %v2152_v2, %v2153_v62  ;;  %v1227_v15 = vpack.c.bf16 %v2152_v2, %v2147_v58  ;;  %1309 = vrot.lane.b32.xlu1 %v1233_v42, %s2359_s16  ;;  %v2187_v18 = vunpack.i.l.bf16 %v2806_v61  ;;  %v1234_v58 = vpack.c.bf16 %v1210_v44, %v1210_v44 }
 0x487   : > { %v1228_v7 = vpack.c.bf16 %v1192_v13, %v1176_v4  ;;  %v2156_v17 = vpop.permute.xlu0 %2155  ;;  %v2188_v4 = vunpack.i.h.bf16 %v2806_v61 }
 0x488   : > { %1297 = vrot.lane.b32.xlu0 %v1227_v15, %s2359_s16  ;;  %v2158_v52 = vunpack.i.h.bf16 %v2156_v17  ;;  %v2157_v11 = vunpack.i.l.bf16 %v2156_v17  ;;  %v1193_v63 = vsel %vm1191_vm14, %v2153_v62, %v2187_v18  ;;  %v2183_v15 = vunpack.i.h.bf16 %v2802_v49 }
 0x489   : > { %v2815_v23 = vpop.permute.xlu1 %2190  ;;  %v1229_v35 = vpack.c.bf16 %v1193_v63, %v1177_v32  ;;  %v1194_v63 = vsel %vm1191_vm14, %v2187_v18, %v2188_v4 }
 0x48a   : > { %1299 = vrot.lane.b32.xlu1 %v1228_v7, %s2359_s16  ;;  %v2192_v28 = vunpack.i.l.bf16 %v2815_v23  ;;  %v1144_v29 = vsel %vm390_vm0, %v2157_v11, %v2158_v52  ;;  %v1178_v49 = vsel %vm1175_vm13, %v2182_v22, %v2183_v15 }
 0x48b   : > { %v2161_v26 = vpop.permute.xlu0 %2160  ;;  %v1230_v32 = vpack.c.bf16 %v1194_v63, %v1178_v49 }
 0x48c   : > { %v2163_v30 = vunpack.i.h.bf16 %v2161_v26  ;;  %v2162_v31 = vunpack.i.l.bf16 %v2161_v26  ;;  %1307 = vrot.lane.b32.xlu0 %v1232_v25, %s2359_s16  ;;  %v1145_v59 = vsel %vm390_vm0, %v2158_v52, %v2192_v28 }
 0x48d   : > { %v2196_v8 = vpop.permute.xlu1 %2195 }
 0x48e   : > { %v1160_v36 = vsel %vm1159_vm15, %v2162_v31, %v2163_v30  ;;  %v2197_v37 = vunpack.i.l.bf16 %v2196_v8  ;;  %v1223_v7 = vpack.c.bf16 %v2162_v31, %v2157_v11  ;;  %v2198_v61 = vunpack.i.h.bf16 %v2196_v8 }
 0x48f   : > { %v1224_v56 = vpack.c.bf16 %v1160_v36, %v1144_v29  ;;  %v2166_v50 = vpop.permute.xlu0 %2165  ;;  %v2193_v11 = vunpack.i.h.bf16 %v2815_v23  ;;  %v2138_v31 = vunpack.i.h.bf16 %v2800_v1 }
 0x490   : > { %v1161_v40 = vsel %vm1159_vm15, %v2163_v30, %v2197_v37  ;;  %1301 = vrot.lane.b32.xlu0 %v1229_v35, %s2359_s16  ;;  %v2168_v46 = vunpack.i.h.bf16 %v2166_v50  ;;  %v2167_v0 = vunpack.i.l.bf16 %v2166_v50  ;;  %v1162_v18 = vsel %vm1159_vm15, %v2197_v37, %v2198_v61 }
 0x491   : > { %v1225_v41 = vpack.c.bf16 %v1161_v40, %v1145_v59  ;;  %v2201_v45 = vpop.permute.xlu1 %2200  ;;  %1291 = vrot.lane.b32.xlu1 %v1224_v56, %s2359_s16  ;;  %v1146_v22 = vsel %vm390_vm0, %v2192_v28, %v2193_v11  ;;  %v1924_v59 = vld [vmem:[%s3057_s3 + $0x18] sm:$0xff] }
 0x492   : > { %v1111_v47 = vsel %vm1109_vm9, %v2167_v0, %v2168_v46  ;;  %v2202_v27 = vunpack.i.l.bf16 %v2201_v45  ;;  %v1112_v26 = vsel %vm1109_vm9, %v2168_v46, %v2137_v20  ;;  %v2203_v8 = vunpack.i.h.bf16 %v2201_v45 }
 0x493   : > { %v2171_v53 = vpop.permute.xlu0 %2170  ;;  %v1110_v29 = vsel %vm1109_vm9, %v2138_v31, %v2167_v0  ;;  %v1226_v36 = vpack.c.bf16 %v1162_v18, %v1146_v22  ;;  %vm1313_vm9 = vcmask 343040  }
 0x494   : > { %v2173_v16 = vunpack.i.h.bf16 %v2171_v53  ;;  %v2172_v48 = vunpack.i.l.bf16 %v2171_v53  ;;  %1293 = vrot.lane.b32.xlu0 %v1225_v41, %s2359_s16  ;;  %v1131_v38 = vsel %vm358_vm1, %v2202_v27, %v2203_v8 }
 0x495   : > { %v2206_v55 = vpop.permute.xlu1 %2205  ;;  %v1222_v37 = vpack.c.bf16 %v1131_v38, %v2137_v20 }
 0x496   : > { %v1129_v62 = vsel %vm358_vm1, %v2172_v48, %v2173_v16  ;;  %v2208_v42 = vunpack.i.h.bf16 %v2206_v55  ;;  %v2207_v13 = vunpack.i.l.bf16 %v2206_v55  ;;  %v1130_v52 = vsel %vm358_vm1, %v2173_v16, %v2202_v27 }
 0x497   : > { %v1220_v2 = vpack.c.bf16 %v1129_v62, %v1111_v47  ;;  %v1221_v30 = vpack.c.bf16 %v1130_v52, %v1112_v26  ;;  %v1093_v35 = vpop.permute.xlu0 %1092 }
 0x498   : > { %1311 = vrot.lane.b32.xlu0 %v1234_v58, %s2359_s16  ;;  %v1095_v17 = vsel %vm290_vm5, %v2207_v13, %v2208_v42  ;;  %v1096_v1 = vsel %vm290_vm5, %v2208_v42, %v1093_v35  ;;  %v1094_v56 = vsel %vm290_vm5, %v2698_v57, %v2207_v13  ;;  %v1218_v50 = vpack.c.bf16 %v1093_v35, %v2774_v34  ;;  %v2281_v35 = vld [vmem:[%s3056_s2 + $0x8] sm:$0xff]  }
 0x499   : > { %1283 = vrot.lane.b32.xlu1 %v1220_v2, %s2359_s16  ;;  %v1216_v25 = vpack.c.bf16 %v1095_v17, %v2782_v39  ;;  %v1128_v39 = vsel %vm358_vm1, %v2798_v43, %v2172_v48  ;;  %v1217_v43 = vpack.c.bf16 %v1096_v1, %v2778_v60  ;;  %v1215_v28 = vpack.c.bf16 %v1094_v56, %v2353_v24  ;;  %v1923_v60 = vld [vmem:[%s3057_s3 + $0x10] sm:$0xff] }
 0x49a   : > { %v1219_v23 = vpack.c.bf16 %v1128_v39, %v1110_v29 }
 0x49c   : > { %1289 = vrot.lane.b32.xlu0 %v1223_v7, %s2359_s16 }
 0x49d   : > { %1275 = vrot.lane.b32.xlu1 %v1216_v25, %s2359_s16 }
 0x4a0   : > { %1285 = vrot.lane.b32.xlu0 %v1221_v30, %s2359_s16 }
 0x4a1   : > { %1303 = vrot.lane.b32.xlu1 %v1230_v32, %s2359_s16 }
 0x4a4   : > { %1281 = vrot.lane.b32.xlu0 %v1219_v23, %s2359_s16 }
 0x4a5   : > { %1295 = vrot.lane.b32.xlu1 %v1226_v36, %s2359_s16 }
 0x4a8   : > { %1277 = vrot.lane.b32.xlu0 %v1217_v43, %s2359_s16 }
 0x4a9   : > { %1287 = vrot.lane.b32.xlu1 %v1222_v37, %s2359_s16 }
 0x4ac   : > { %1273 = vrot.lane.b32.xlu0 %v1215_v28, %s2359_s16 }
 0x4ad   : > { %1279 = vrot.lane.b32.xlu1 %v1218_v50, %s2359_s16 }
 0x4b0   : > { %1240 = vperm.xlu0 %2053, %v1923_v60  }
 0x4b1   : > { %1245 = vperm.xlu1 %2052, %v1924_v59  }
 0x4f4   : > { %v1306_v40 = vpop.permute.xlu1 %1305 }
 0x4f8   : > { %v1310_v45 = vpop.permute.xlu1 %1309 }
 0x4fa   : > { %v1298_v41 = vpop.permute.xlu0 %1297 }
 0x4fc   : > { %v1300_v53 = vpop.permute.xlu1 %1299 }
 0x4fd   : > { %v1323_v55 = vsel %vm1313_vm9, %v1298_v41, %v1300_v53 }
 0x4fe   : > { %v1308_v46 = vpop.permute.xlu0 %1307 }
 0x4ff   : > { %v1326_v34 = vsel %vm1313_vm9, %v1306_v40, %v1308_v46  ;;  %v1327_v0 = vsel %vm1313_vm9, %v1308_v46, %v1310_v45 }
 0x500   : > { %v1349_v44 = vsel %vm531_vm8, %v1326_v34, 0  ;;  %1926 = vmatprep.subr.msk.bf16.mxu0 %vm531_vm8, %v1327_v0 }
 0x501   : > { %1367 = vmatpush1.bf16.msra.mxu0 %v1349_v44 }
 0x502   : > { %v1302_v16 = vpop.permute.xlu0 %1301 }
 0x503   : > { %v1324_v48 = vsel %vm1313_vm9, %v1300_v53, %v1302_v16  ;;  %v1292_v58 = vpop.permute.xlu1 %1291 }
 0x504   : > { %1368 = vmatprep.subr.bf16.mxu0 %v1324_v48 }
 0x505   : > { %1369 = vmatpush1.bf16.msra.mxu0 %v1323_v55 }
 0x506   : > { %v1294_v47 = vpop.permute.xlu0 %1293 }
 0x507   : > { %v1321_v62 = vsel %vm1313_vm9, %v1292_v58, %v1294_v47 }
 0x508   : > { %1370 = vmatprep.subr.bf16.mxu0 %v1321_v62 }
 0x50a   : > { %v1312_v2 = vpop.permute.xlu0 %1311 }
 0x50b   : > { %v1328_v42 = vsel %vm1313_vm9, %v1310_v45, %v1312_v2  ;;  %1928 = vmatprep.subr.msk.bf16.mxu1 %vm531_vm8, %v1312_v2  ;;  %v1284_v4 = vpop.permute.xlu1 %1283 }
 0x50c   : > { %v1355_v13 = vsel %vm531_vm8, %v1328_v42, 0 }
 0x50d   : > { %1410 = vmatpush1.bf16.msra.mxu1 %v1355_v13 }
 0x50e   : > { %v1290_v27 = vpop.permute.xlu0 %1289 }
 0x50f   : > { %v1320_v15 = vsel %vm1313_vm9, %v1290_v27, %v1292_v58  ;;  %v1276_v7 = vpop.permute.xlu1 %1275 }
 0x510   : > { %1371 = vmatpush1.bf16.msra.mxu0 %v1320_v15 }
 0x512   : > { %v1286_v17 = vpop.permute.xlu0 %1285 }
 0x513   : > { %v1304_v20 = vpop.permute.xlu1 %1303  ;;  %v1318_v52 = vsel %vm1313_vm9, %v1284_v4, %v1286_v17 }
 0x514   : > { %v1325_v25 = vsel %vm1313_vm9, %v1302_v16, %v1304_v20  ;;  %1372 = vmatprep.subr.bf16.mxu0 %v1318_v52  ;;  %1411 = vmatprep.subr.bf16.mxu1 %v1304_v20 }
 0x515   : > { %1412 = vmatpush1.bf16.msra.mxu1 %v1325_v25 }
 0x516   : > { %v1282_v63 = vpop.permute.xlu0 %1281 }
 0x517   : > { %v1317_v61 = vsel %vm1313_vm9, %v1282_v63, %v1284_v4  ;;  %v1296_v26 = vpop.permute.xlu1 %1295 }
 0x518   : > { %v1322_v49 = vsel %vm1313_vm9, %v1294_v47, %v1296_v26  ;;  %1373 = vmatpush1.bf16.msra.mxu0 %v1317_v61  ;;  %1413 = vmatprep.subr.bf16.mxu1 %v1296_v26 }
 0x519   : > { %1414 = vmatpush1.bf16.msra.mxu1 %v1322_v49 }
 0x51a   : > { %v1278_v11 = vpop.permute.xlu0 %1277 }
 0x51b   : > { %v1288_v30 = vpop.permute.xlu1 %1287  ;;  %v1315_v31 = vsel %vm1313_vm9, %v1276_v7, %v1278_v11 }
 0x51c   : > { %v1319_v32 = vsel %vm1313_vm9, %v1286_v17, %v1288_v30  ;;  %1374 = vmatprep.subr.bf16.mxu0 %v1315_v31  ;;  %1415 = vmatprep.subr.bf16.mxu1 %v1288_v30 }
 0x51d   : > { %1416 = vmatpush1.bf16.msra.mxu1 %v1319_v32 }
 0x51e   : > { %v1274_v39 = vpop.permute.xlu0 %1273 }
 0x51f   : > { %v1314_v18 = vsel %vm1313_vm9, %v1274_v39, %v1276_v7  ;;  %v1280_v8 = vpop.permute.xlu1 %1279 }
 0x520   : > { %v1316_v29 = vsel %vm1313_vm9, %v1278_v11, %v1280_v8  ;;  %1375 = vmatpush1.bf16.msra.mxu0 %v1314_v18  ;;  %1417 = vmatprep.subr.bf16.mxu1 %v1280_v8 }
 0x521   : > { %1418 = vmatpush1.bf16.msra.mxu1 %v1316_v29 }
 0x523   : > { %1927 = vmatmul.mubr.msk.bf16.vlgmr.msra.gmra.mxu0 %vm527_vm10, %v2281_v35 }
 0x524   : > { %1929 = vmatmul.mubr.msk.bf16.vlgmr.msra.gmra.mxu1 %vm527_vm10, %v2281_v35  ;;  %1782 = vmatprep.mubr.bf16.mxu0 %v2352_v33 }
 0x525   : > { %1823 = vmatprep.mubr.bf16.mxu1 %v2352_v33 }
 0x52b   : > { %v1241_v33 = vpop.permute.xlu0 %1240 }
 0x52c   : > { %v1246_v38 = vpop.permute.xlu1 %1245 }
 0x5e3   : > { %v1394_v22 = vpop.f32.mrf.mxu0 }
 0x5e4   : > { %v1437_v23 = vpop.f32.mrf.mxu1  ;;  %v1395_v0 = vadd.f32 %v1394_v22, %v1241_v33 }
 0x5e5   : > { %v1396_v36 = vpop.f32.mrf.mxu0  ;;  %v1438_v44 = vadd.f32 %v1437_v23, %v1241_v33 }
 0x5e6   : > { %v1439_v1 = vpop.f32.mrf.mxu1  ;;  %v1397_v53 = vadd.f32 %v1396_v36, %v1241_v33 }
 0x5e7   : > { %v1398_v43 = vpop.f32.mrf.mxu0  ;;  %v1440_v16 = vadd.f32 %v1439_v1, %v1241_v33 }
 0x5e8   : > { %v1399_v37 = vadd.f32 %v1398_v43, %v1246_v38  ;;  %v1441_v56 = vpop.f32.mrf.mxu1 }
 0x5e9   : > { %v1442_v28 = vadd.f32 %v1441_v56, %v1246_v38  ;;  %v1400_v50 = vpop.f32.mrf.mxu0 }
 0x5ea   : > { %v1930_v60 = vmul.f32 -1.442695, %v1399_v37  ;;  %v1401_v59 = vadd.f32 %v1400_v50, %v1246_v38  ;;  %v1443_v40 = vpop.f32.mrf.mxu1 }
 0x5eb   : > { %v1932_v41 = vmul.f32 -1.442695, %v1442_v28  ;;  %v1444_v45 = vadd.f32 %v1443_v40, %v1246_v38 }
 0x5ec   : > { %2307 = vpow2.f32 %v1930_v60  ;;  %v1931_v46 = vmul.f32 -1.442695, %v1401_v59 }
 0x5ed   : > { %2309 = vpow2.f32 %v1932_v41  ;;  %v1933_v34 = vmul.f32 -1.442695, %v1444_v45 }
 0x5ee   : > { %2311 = vpow2.f32 %v1931_v46 }
 0x5ef   : > { %2313 = vpow2.f32 %v1933_v34 }
 0x5f0   : > { %2315 = vtanh.f32 %v1395_v0 }
 0x5f1   : > { %2317 = vtanh.f32 %v1438_v44 }
 0x5f2   : > { %2319 = vtanh.f32 %v1397_v53 }
 0x5f3   : > { %2321 = vtanh.f32 %v1440_v16 }
 0x5f9   : > { %v2308_v48 = vpop.eup %2307 }
 0x5fa   : > { %v2310_v55 = vpop.eup %2309  ;;  %v1462_v58 = vadd.f32 1.0, %v2308_v48 }
 0x5fb   : > { %v2312_v47 = vpop.eup %2311  ;;  %v1464_v62 = vadd.f32 1.0, %v2310_v55 }
 0x5fc   : > { %v2314_v2 = vpop.eup %2313  ;;  %2323 = vrcp.f32 %v1462_v58  ;;  %v1463_v42 = vadd.f32 1.0, %v2312_v47 }
 0x5fd   : > { %2325 = vrcp.f32 %v1464_v62  ;;  %v1465_v4 = vadd.f32 1.0, %v2314_v2  ;;  %v2316_v13 = vpop.eup %2315 }
 0x5fe   : > { %2327 = vrcp.f32 %v1463_v42  ;;  %v2318_v27 = vpop.eup %2317 }
 0x5ff   : > { %2329 = vrcp.f32 %v1465_v4  ;;  %v2320_v15 = vpop.eup %2319 }
 0x600   : > { %v2322_v7 = vpop.eup %2321 }
 0x609   : > { %v2324_v17 = vpop.eup %2323 }
 0x60a   : > { %v2326_v20 = vpop.eup %2325  ;;  %v1474_v52 = vmul.f32 %v2324_v17, %v2316_v13 }
 0x60b   : > { %v2328_v25 = vpop.eup %2327  ;;  %v1476_v63 = vmul.f32 %v2326_v20, %v2318_v27 }
 0x60c   : > { %v2330_v61 = vpop.eup %2329  ;;  %v1475_v26 = vmul.f32 %v2328_v25, %v2320_v15  ;;  %v2903_v30 = vmul.f32 %v1474_v52, %v2608_v9 }
 0x60d   : > { %v2900_v49 = vmul.f32 %v1476_v63, %v2592_v54  ;;  %v1477_v11 = vmul.f32 %v2330_v61, %v2322_v7 }
 0x60e   : > { %v2906_v31 = vmul.f32 %v1475_v26, %v2613_v12 }
 0x60f   : > { %1506 = vrot.lane.b32.xlu0 %v2900_v49, %s2348_s8  ;;  %v1481_v32 = vmul.f32 %v1477_v11, %v2603_v5 }
 0x610   : > { %v2209_v39 = vpack.i.bf16 %v2906_v31, %v2903_v30 }
 0x611   : > { %v1482_v18 = vsel %vm687_vm11, %v1481_v32, 0.0 }
 0x612   : > { %2210 = vrot.lane.b32.xlu1 %v2209_v39, %s2343_s27  ;;  %v2249_v54 = vpack.i.bf16 %v1482_v18, %v2900_v49 }
 0x614   : > { %2250 = vrot.lane.b32.xlu0 %v2249_v54, %s2343_s27 }
 0x616   : > { %2215 = vrot.lane.b32.xlu1 %v2209_v39, %s2344_s28 }
 0x618   : > { %2255 = vrot.lane.b32.xlu0 %v2249_v54, %s2344_s28 }
 0x61a   : > { %2220 = vrot.lane.b32.xlu1 %v2209_v39, %s2345_s29 }
 0x61c   : > { %2260 = vrot.lane.b32.xlu0 %v2249_v54, %s2345_s29 }
 0x61e   : > { %2225 = vrot.lane.b32.xlu1 %v2209_v39, %s2346_s30 }
 0x620   : > { %2265 = vrot.lane.b32.xlu0 %v2249_v54, %s2346_s30 }
 0x622   : > { %2230 = vrot.lane.b32.xlu1 %v2209_v39, %s2347_s7 }
 0x624   : > { %2270 = vrot.lane.b32.xlu0 %v2249_v54, %s2347_s7 }
 0x626   : > { %2235 = vrot.lane.b32.xlu1 %v2209_v39, %s2348_s8 }
 0x628   : > { %2275 = vrot.lane.b32.xlu0 %v2249_v54, %s2349_s9 }
 0x62a   : > { %2240 = vrot.lane.b32.xlu1 %v2209_v39, %s2349_s9  ;;  %s1945_s9 = sshll.u32 %s3077_s22, 5 }
 0x62b   : > { %s251_s25 = scalar_lea.vmem %s3060_s6, %s1945_s9 }
 0x62c   : > { %1493 = vrot.lane.b32.xlu0 %v2900_v49, %s2350_s10 }
 0x62e   : > { %2245 = vrot.lane.b32.xlu1 %v2209_v39, %s2350_s10 }
 0x681   : > { %v2931_v5 = vpop.permute.xlu0 %1506 }
 0x684   : > { %v2211_v9 = vpop.permute.xlu1 %2210 }
 0x685   : > { %v2213_v12 = vunpack.i.h.bf16 %v2211_v9  ;;  %v2212_v8 = vunpack.i.l.bf16 %v2211_v9 }
 0x686   : > { %v2251_v35 = vpop.permute.xlu0 %2250 }
 0x687   : > { %v1600_v29 = vsel %vm390_vm0, %v2212_v8, %v2213_v12  ;;  %v1623_v22 = vpack.c.bf16 %v2212_v8, %v2212_v8  ;;  %v2253_v17 = vunpack.i.h.bf16 %v2251_v35  ;;  %v2252_v52 = vunpack.i.l.bf16 %v2251_v35 }
 0x688   : > { %v1624_v23 = vpack.c.bf16 %v1600_v29, %v1600_v29  ;;  %v2934_v36 = vpop.permute.xlu1 %2215 }
 0x689   : > { %1696 = vrot.lane.b32.xlu1 %v1623_v22, %s2351_s11  ;;  %v2217_v43 = vunpack.i.l.bf16 %v2934_v36  ;;  %v2218_v50 = vunpack.i.h.bf16 %v2934_v36  ;;  %v1601_v8 = vsel %vm390_vm0, %v2213_v12, %v2252_v52  ;;  %v1602_v35 = vsel %vm390_vm0, %v2252_v52, %v2253_v17 }
 0x68a   : > { %v2937_v1 = vpop.permute.xlu0 %2255  ;;  %1698 = vrot.lane.b32.xlu0 %v1624_v23, %s2351_s11  ;;  %v1625_v22 = vpack.c.bf16 %v1601_v8, %v1601_v8  ;;  %v1626_v23 = vpack.c.bf16 %v1602_v35, %v1602_v35  ;;  %vm3062_vm0 = vcmask 171008  }
 0x68b   : > { %v2257_v37 = vunpack.i.l.bf16 %v2937_v1  ;;  %v1570_v12 = vsel %vm358_vm1, %v2217_v43, %v2218_v50  ;;  %vm3071_vm12 = vmmov %vm3062_vm0 }
 0x68c   : > { %v2221_v38 = vpop.permute.xlu1 %2220  ;;  %vm3072_vm13 = vmmov %vm3062_vm0 }
 0x68d   : > { %v2222_v56 = vunpack.i.l.bf16 %v2221_v38  ;;  %v2223_v60 = vunpack.i.h.bf16 %v2221_v38  ;;  %v1571_v45 = vsel %vm358_vm1, %v2218_v50, %v2257_v37  ;;  %vm3073_vm14 = vmmov %vm3062_vm0 }
 0x68e   : > { %v2261_v28 = vpop.permute.xlu0 %2260  ;;  %vm3074_vm15 = vmmov %vm3062_vm0 }
 0x68f   : > { %v1619_v59 = vpack.c.bf16 %v2222_v56, %v2217_v43  ;;  %v2262_v40 = vunpack.i.l.bf16 %v2261_v28  ;;  %v1585_v36 = vsel %vm374_vm2, %v2222_v56, %v2223_v60  ;;  %v2263_v38 = vunpack.i.h.bf16 %v2261_v28  ;;  %vm3075_vm9 = vmmov %vm3062_vm0 }
 0x690   : > { %v2943_v41 = vpop.permute.xlu1 %2225 }
 0x691   : > { %v1586_v46 = vsel %vm374_vm2, %v2223_v60, %v2262_v40  ;;  %1688 = vrot.lane.b32.xlu1 %v1619_v59, %s2351_s11  ;;  %v2227_v44 = vunpack.i.l.bf16 %v2943_v41  ;;  %v2228_v55 = vunpack.i.h.bf16 %v2943_v41  ;;  %v2258_v59 = vunpack.i.h.bf16 %v2937_v1 }
 0x692   : > { %v1621_v34 = vpack.c.bf16 %v1586_v46, %v1571_v45  ;;  %v2950_v33 = vpop.permute.xlu0 %2265  ;;  %v1620_v41 = vpack.c.bf16 %v1585_v36, %v1570_v12  ;;  %v1587_v46 = vsel %vm374_vm2, %v2262_v40, %v2263_v38  ;;  %vm3064_vm2 = vmmov %vm3062_vm0 }
 0x693   : > { %v2267_v53 = vunpack.i.l.bf16 %v2950_v33  ;;  %v1572_v56 = vsel %vm358_vm1, %v2257_v37, %v2258_v59  ;;  %v1540_v43 = vsel %vm326_vm4, %v2227_v44, %v2228_v55  ;;  %v2268_v28 = vunpack.i.h.bf16 %v2950_v33  ;;  %vm3063_vm1 = vmmov %vm3062_vm0 }
 0x694   : > { %v2231_v0 = vpop.permute.xlu1 %2230  ;;  %1692 = vrot.lane.b32.xlu0 %v1621_v34, %s2351_s11  ;;  %v1622_v50 = vpack.c.bf16 %v1587_v46, %v1572_v56 }
 0x695   : > { %v2232_v16 = vunpack.i.l.bf16 %v2231_v0  ;;  %v2233_v58 = vunpack.i.h.bf16 %v2231_v0  ;;  %v1541_v42 = vsel %vm326_vm4, %v2228_v55, %v2267_v53  ;;  %v1542_v1 = vsel %vm326_vm4, %v2267_v53, %v2268_v28  ;;  %vm3066_vm4 = vmmov %vm3062_vm0 }
 0x696   : > { %v2271_v48 = vpop.permute.xlu0 %2270 }
 0x697   : > { %v1615_v47 = vpack.c.bf16 %v2232_v16, %v2227_v44  ;;  %v2272_v62 = vunpack.i.l.bf16 %v2271_v48  ;;  %v1555_v34 = vsel %vm342_vm3, %v2232_v16, %v2233_v58  ;;  %v2273_v0 = vunpack.i.h.bf16 %v2271_v48 }
 0x698   : > { %v2236_v2 = vpop.permute.xlu1 %2235  ;;  %v1616_v60 = vpack.c.bf16 %v1555_v34, %v1540_v43 }
 0x699   : > { %v1556_v4 = vsel %vm342_vm3, %v2233_v58, %v2272_v62  ;;  %1680 = vrot.lane.b32.xlu1 %v1615_v47, %s2351_s11  ;;  %v2238_v15 = vunpack.i.h.bf16 %v2236_v2  ;;  %v2237_v7 = vunpack.i.l.bf16 %v2236_v2 }
 0x69a   : > { %v1617_v13 = vpack.c.bf16 %v1556_v4, %v1541_v42  ;;  %v2276_v27 = vpop.permute.xlu0 %2275 }
 0x69b   : > { %v2277_v25 = vunpack.i.l.bf16 %v2276_v27  ;;  %v1510_v26 = vsel %vm290_vm5, %v2238_v15, %v2931_v5  ;;  %v1508_v11 = vsel %vm290_vm5, %v2698_v57, %v2237_v7  ;;  %v2278_v40 = vunpack.i.h.bf16 %v2276_v27 }
 0x69c   : > { %v2241_v20 = vpop.permute.xlu1 %2240  ;;  %1684 = vrot.lane.b32.xlu0 %v1617_v13, %s2351_s11  ;;  %v1509_v37 = vsel %vm290_vm5, %v2237_v7, %v2238_v15  ;;  %vm3067_vm5 = vmmov %vm3062_vm0 }
 0x69d   : > { %v2243_v63 = vunpack.i.h.bf16 %v2241_v20  ;;  %v2242_v61 = vunpack.i.l.bf16 %v2241_v20  ;;  %v1527_v58 = vsel %vm309_vm6, %v2277_v25, %v2278_v40 }
 0x69e   : > { %v1494_v57 = vpop.permute.xlu0 %1493 }
 0x69f   : > { %v1526_v32 = vsel %vm309_vm6, %v2243_v63, %v2277_v25  ;;  %v1524_v39 = vsel %vm309_vm6, %v2647_v19, %v2242_v61  ;;  %v1525_v16 = vsel %vm309_vm6, %v2242_v61, %v2243_v63  ;;  %v1610_v53 = vpack.c.bf16 %v1494_v57, %v2900_v49  ;;  %vm3068_vm6 = vmmov %vm3062_vm0 }
 0x6a0   : > { %v1611_v18 = vpack.c.bf16 %v1524_v39, %v1508_v11  ;;  %v1613_v54 = vpack.c.bf16 %v1526_v32, %v1510_v26  ;;  %v2246_v9 = vpop.permute.xlu1 %2245  ;;  %v1612_v55 = vpack.c.bf16 %v1525_v16, %v1509_v37 }
 0x6a1   : > { %v2248_v29 = vunpack.i.h.bf16 %v2246_v9  ;;  %v2247_v48 = vunpack.i.l.bf16 %v2246_v9 }
 0x6a2   : > { %1672 = vrot.lane.b32.xlu1 %v1611_v18, %s2351_s11  ;;  %1676 = vrot.lane.b32.xlu0 %v1613_v54, %s2351_s11 }
 0x6a3   : > { %v1497_v19 = vsel %vm274_vm7, %v2248_v29, %v1494_v57  ;;  %v1496_v47 = vsel %vm274_vm7, %v2247_v48, %v2248_v29  ;;  %v1495_v33 = vsel %vm274_vm7, %v2133_v14, %v2247_v48  ;;  %vm3069_vm7 = vmmov %vm3062_vm0 }
 0x6a4   : > { %v1609_v45 = vpack.c.bf16 %v1497_v19, %v2906_v31  ;;  %v1557_v31 = vsel %vm342_vm3, %v2272_v62, %v2273_v0  ;;  %v1614_v62 = vpack.c.bf16 %v1527_v58, %v2931_v5  ;;  %v1608_v2 = vpack.c.bf16 %v1496_v47, %v2903_v30  ;;  %v839_v30 = vld [vmem:[%s3059_s5] sm:$0xff]  ;;  %vm3065_vm3 = vmmov %vm3062_vm0  ;;  %v2282_v0 = vld [vmem:[%s3058_s4 + $0x8] sm:$0xff]  }
 0x6a5   : > { %v1618_v44 = vpack.c.bf16 %v1557_v31, %v1542_v1  ;;  %v1607_v42 = vpack.c.bf16 %v1495_v33, %v2353_v24 }
 0x6a6   : > { %1700 = vrot.lane.b32.xlu1 %v1625_v22, %s2351_s11  ;;  %1702 = vrot.lane.b32.xlu0 %v1626_v23, %s2351_s11 }
 0x6aa   : > { %1690 = vrot.lane.b32.xlu1 %v1620_v41, %s2351_s11  ;;  %1668 = vrot.lane.b32.xlu0 %v1609_v45, %s2351_s11 }
 0x6ae   : > { %1682 = vrot.lane.b32.xlu1 %v1616_v60, %s2351_s11  ;;  %1694 = vrot.lane.b32.xlu0 %v1622_v50, %s2351_s11 }
 0x6b2   : > { %1674 = vrot.lane.b32.xlu1 %v1612_v55, %s2351_s11  ;;  %1686 = vrot.lane.b32.xlu0 %v1618_v44, %s2351_s11 }
 0x6b6   : > { %1666 = vrot.lane.b32.xlu1 %v1608_v2, %s2351_s11  ;;  %1678 = vrot.lane.b32.xlu0 %v1614_v62, %s2351_s11 }
 0x6ba   : > { %1664 = vrot.lane.b32.xlu1 %v1607_v42, %s2351_s11  ;;  %1670 = vrot.lane.b32.xlu0 %v1610_v53, %s2351_s11 }
 0x6be   : > { %843 = vperm.xlu1 %2052, %v839_v30   ;;  %1632 = vperm.xlu0 %2053, %v1936_v51  }
 0x6fb   : > { %v1697_v14 = vpop.permute.xlu1 %1696 }
 0x6fc   : > { %v1699_v5 = vpop.permute.xlu0 %1698 }
 0x6fd   : > { %v1716_v7 = vsel %vm3062_vm0, %v1697_v14, %v1699_v5 }
 0x6fe   : > { %v1739_v63 = vsel %vm531_vm8, %v1716_v7, 0 }
 0x703   : > { %v1689_v4 = vpop.permute.xlu1 %1688 }
 0x706   : > { %v1693_v49 = vpop.permute.xlu0 %1692 }
 0x70b   : > { %v1681_v13 = vpop.permute.xlu1 %1680 }
 0x70e   : > { %v1685_v24 = vpop.permute.xlu0 %1684 }
 0x714   : > { %v1673_v27 = vpop.permute.xlu1 %1672  ;;  %v1677_v15 = vpop.permute.xlu0 %1676 }
 0x718   : > { %v1701_v17 = vpop.permute.xlu1 %1700  ;;  %v1703_v20 = vpop.permute.xlu0 %1702 }
 0x719   : > { %v1717_v52 = vsel %vm3063_vm1, %v1699_v5, %v1701_v17  ;;  %v1718_v25 = vsel %vm3064_vm2, %v1701_v17, %v1703_v20  ;;  %1941 = vmatprep.subr.msk.bf16.mxu1 %vm531_vm8, %v1703_v20 }
 0x71a   : > { %v1745_v61 = vsel %vm531_vm8, %v1718_v25, 0  ;;  %1939 = vmatprep.subr.msk.bf16.mxu0 %vm531_vm8, %v1717_v52  ;;  %vm3070_vm8 = vmmov %vm3062_vm0 }
 0x71b   : > { %1757 = vmatpush1.bf16.msra.mxu0 %v1739_v63  ;;  %1798 = vmatpush1.bf16.msra.mxu1 %v1745_v61 }
 0x71c   : > { %v1691_v26 = vpop.permute.xlu1 %1690  ;;  %v1669_v11 = vpop.permute.xlu0 %1668 }
 0x71d   : > { %v1713_v32 = vsel %vm3065_vm3, %v1689_v4, %v1691_v26  ;;  %v1714_v39 = vsel %vm3066_vm4, %v1691_v26, %v1693_v49 }
 0x71e   : > { %1758 = vmatprep.subr.bf16.mxu0 %v1714_v39 }
 0x71f   : > { %1759 = vmatpush1.bf16.msra.mxu0 %v1713_v32 }
 0x720   : > { %v1683_v18 = vpop.permute.xlu1 %1682  ;;  %v1695_v54 = vpop.permute.xlu0 %1694 }
 0x721   : > { %v1710_v9 = vsel %vm3067_vm5, %v1681_v13, %v1683_v18  ;;  %v1715_v8 = vsel %vm3068_vm6, %v1693_v49, %v1695_v54  ;;  %1799 = vmatprep.subr.bf16.mxu1 %v1695_v54  ;;  %v1711_v35 = vsel %vm3069_vm7, %v1683_v18, %v1685_v24 }
 0x722   : > { %1760 = vmatprep.subr.bf16.mxu0 %v1711_v35  ;;  %1800 = vmatpush1.bf16.msra.mxu1 %v1715_v8 }
 0x723   : > { %1761 = vmatpush1.bf16.msra.mxu0 %v1710_v9 }
 0x724   : > { %v1675_v29 = vpop.permute.xlu1 %1674  ;;  %v1687_v22 = vpop.permute.xlu0 %1686 }
 0x725   : > { %v1707_v23 = vsel %vm3070_vm8, %v1673_v27, %v1675_v29  ;;  %v1712_v57 = vsel %vm3071_vm12, %v1685_v24, %v1687_v22  ;;  %1801 = vmatprep.subr.bf16.mxu1 %v1687_v22  ;;  %v1708_v36 = vsel %vm3072_vm13, %v1675_v29, %v1677_v15 }
 0x726   : > { %1762 = vmatprep.subr.bf16.mxu0 %v1708_v36  ;;  %1802 = vmatpush1.bf16.msra.mxu1 %v1712_v57 }
 0x727   : > { %1763 = vmatpush1.bf16.msra.mxu0 %v1707_v23 }
 0x728   : > { %v1667_v38 = vpop.permute.xlu1 %1666  ;;  %v1679_v19 = vpop.permute.xlu0 %1678 }
 0x729   : > { %v1709_v12 = vsel %vm3073_vm14, %v1677_v15, %v1679_v19  ;;  %1803 = vmatprep.subr.bf16.mxu1 %v1679_v19  ;;  %v1705_v59 = vsel %vm3074_vm15, %v1667_v38, %v1669_v11 }
 0x72a   : > { %1764 = vmatprep.subr.bf16.mxu0 %v1705_v59  ;;  %1804 = vmatpush1.bf16.msra.mxu1 %v1709_v12 }
 0x72c   : > { %v1665_v41 = vpop.permute.xlu1 %1664  ;;  %v1671_v45 = vpop.permute.xlu0 %1670 }
 0x72d   : > { %v1704_v46 = vsel %vm3075_vm9, %v1665_v41, %v1667_v38  ;;  %v1706_v34 = vsel %vm3062_vm0, %v1669_v11, %v1671_v45  ;;  %1805 = vmatprep.subr.bf16.mxu1 %v1671_v45 }
 0x72e   : > { %1765 = vmatpush1.bf16.msra.mxu0 %v1704_v46  ;;  %1806 = vmatpush1.bf16.msra.mxu1 %v1706_v34 }
 0x731   : > { %1940 = vmatmul.mubr.msk.bf16.vlgmr.msra.gmra.mxu0 %vm527_vm10, %v2282_v0  ;;  %1942 = vmatmul.mubr.msk.bf16.vlgmr.msra.gmra.mxu1 %vm527_vm10, %v2282_v0 }
 0x739   : > { %v844_v56 = vpop.permute.xlu1 %843  ;;  %v1633_v43 = vpop.permute.xlu0 %1632 }
 0x73a   : > { %v997_v60 = vadd.f32 %v2755_v3, %v844_v56  ;;  %v1040_v31 = vadd.f32 %v2757_v21, %v844_v56  ;;  %v999_v48 = vadd.f32 %v2760_v6, %v844_v56  ;;  %v1042_v1 = vadd.f32 %v2762_v10, %v844_v56 }
 0x7f1   : > { %v1784_v28 = vpop.f32.mrf.mxu0  ;;  %v1825_v50 = vpop.f32.mrf.mxu1 }
 0x7f2   : > { %v1785_v40 = vadd.f32 %v1784_v28, %v1633_v43  ;;  %v1826_v16 = vadd.f32 %v1825_v50, %v1633_v43 }
 0x7f3   : > { %v1786_v37 = vpop.f32.mrf.mxu0  ;;  %v1827_v44 = vpop.f32.mrf.mxu1 }
 0x7f4   : > { %v1832_v55 = vadd.f32 %v1785_v40, %v997_v60  ;;  %v1834_v58 = vadd.f32 %v1826_v16, %v1040_v31  ;;  %v1787_v47 = vadd.f32 %v1786_v37, %v1633_v43  ;;  %v1828_v62 = vadd.f32 %v1827_v44, %v1633_v43 }
 0x7f5   : > { %v1788_v3 = vpop.f32.mrf.mxu0  ;;  %v1829_v2 = vpop.f32.mrf.mxu1 }
 0x7f6   : > { %v1836_v21 = vmul.f32 0.70710677, %v1832_v55  ;;  %v1838_v33 = vmul.f32 0.70710677, %v1834_v58  ;;  %v1833_v53 = vadd.f32 %v1787_v47, %v999_v48  ;;  %v1835_v42 = vadd.f32 %v1828_v62, %v1042_v1 }
 0x7f7   : > { %v1789_v30 = vpop.f32.mrf.mxu0  ;;  %v1830_v6 = vpop.f32.mrf.mxu1 }
 0x7f8   : > { %1840 = vst [vmem:[%s251_s25] sm:$0xff] %v1836_v21  ;;  %1842 = vst [vmem:[%s251_s25 + $0x10] sm:$0xff] %v1838_v33  ;;  %v1837_v10 = vmul.f32 0.70710677, %v1833_v53  ;;  %v1839_v51 = vmul.f32 0.70710677, %v1835_v42 }
 0x7fa   : > { %1841 = vst [vmem:[%s251_s25 + $0x8] sm:$0xff] %v1837_v10  ;;  %1843 = vst.msk [vmem:[%s251_s25 + $0x18] sm:$0xff] %vm687_vm11, %v1839_v51 }
 0x7fb PF: > { %s16_s21 = sadd.s32 1, %s2341_s21  }
 0x7fc   : > { %p13_p4 = scmp.ge.s32.totalorder %s16_s21, 4  }
 0x7fe   :  { %15 = sbr.rel (!%p13_p4) target bundleno = 1 (0x1), region = 78 }

</bundles_post_ra>
